<compile_context>
chip_gen: v5e
topology: v5e:2x2
jax: 0.10.0
libtpu: 0.0.40
codegen_flags: <defaults>
</compile_context>

<pallas_src>
import jax
import jax.numpy as jnp
import numpy as np
from jax import lax
from jax.experimental import pallas as pl
from jax.experimental.pallas import tpu as pltpu  # noqa: F401  (TPU backend)


def _detective_kernel(x_ref, w_ref, b_ref, o_ref):
    # x_ref: (B, Ks, 128) f32 -- flattened activations, lane-dense
    # w_ref: (N, Ks, 128) f32 -- Linear weight in natural row order, lane-dense
    # b_ref: (1, N)  f32
    # o_ref: (B, N)  f32
    B = x_ref.shape[0]
    N = w_ref.shape[0]

    # Logits z[b, n] = sum_k x[b, k] * w[n, k], computed as B*N (= 6) VPU
    # multiply-reduces over (Ks, 128) planes.  Assemble the tiny (B, N) logits
    # tile with iota masks + scalar selects (no MXU, no transposes).
    row_idx = lax.broadcasted_iota(jnp.int32, (B, N), 0)
    col_idx = lax.broadcasted_iota(jnp.int32, (B, N), 1)
    z = jnp.zeros((B, N), dtype=jnp.float32)
    for b in range(B):                       # static unroll (B = 2)
        xb = x_ref[b]                        # (Ks, 128)
        for n in range(N):                   # static unroll (N = 3)
            s = jnp.sum(xb * w_ref[n])       # f32 multiply-reduce -> scalar
            z = jnp.where((row_idx == b) & (col_idx == n), s, z)

    z = z + b_ref[...]                       # (B, N) logits

    # Softmax over dim=0 (the batch axis), matching nn.Softmax(dim=0).
    m = jnp.max(z, axis=0, keepdims=True)
    e = jnp.exp(z - m)
    denom = jnp.sum(e, axis=0, keepdims=True)
    o_ref[...] = (e * pl.reciprocal(denom, approx=False)).astype(o_ref.dtype)


def detective_classifier(x, weight, bias):
    """x: (B, 768, 4, 4, 4) f32; weight: (3, 49152) f32; bias: (3,) f32."""
    B = x.shape[0]
    K = int(np.prod(x.shape[1:]))
    N, Kw = weight.shape
    assert Kw == K, f"weight expects {Kw} features, input flattens to {K}"
    assert K % 128 == 0
    Ks = K // 128

    # Contiguous (free) reshapes into sublane/lane-dense (., 128) planes:
    # equivalent to nn.Flatten followed by chunking the feature axis by 128.
    x3 = x.reshape(B, Ks, 128)
    w3 = weight.reshape(N, Ks, 128)
    b2 = bias.reshape(1, N)

    # TODO(synk): when this head runs repeatedly, keep the 576 KiB weight
    # resident in VMEM across calls (cross-pallas_call VMEM future) or fuse the
    # head into the preceding layer's kernel; not expressible in a one-shot
    # self-contained script.
    return pl.pallas_call(
        _detective_kernel,
        out_shape=jax.ShapeDtypeStruct((B, N), jnp.float32),
        # No grid / no BlockSpecs: whole arrays (~1 MiB) are placed in VMEM,
        # the kernel runs once, and no pipeline double-buffer is allocated.
    )(x3, w3, b2)


if __name__ == "__main__":
    B = 2
    C, D, H, W = 768, 4, 4, 4                 # 768 * 4**3 = 49152 features
    K_FEAT = C * D * H * W
    N_OUT = 3

    key = jax.random.PRNGKey(0)
    kx, kw, kb = jax.random.split(key, 3)

    x = jax.random.normal(kx, (B, C, D, H, W), dtype=jnp.float32)

    # PyTorch-style Linear init: uniform(-1/sqrt(K), 1/sqrt(K)).
    bound = 1.0 / np.sqrt(K_FEAT)
    weight = jax.random.uniform(kw, (N_OUT, K_FEAT), dtype=jnp.float32,
                                minval=-bound, maxval=bound)
    bias = jax.random.uniform(kb, (N_OUT,), dtype=jnp.float32,
                              minval=-bound, maxval=bound)

    out = detective_classifier(x, weight, bias)
    out = jax.block_until_ready(out)

    # float64 numpy reference (avoids a TPU-default reduced-precision matmul in
    # a JAX reference skewing the check); the kernel accumulates in f32.
    xf = np.asarray(x, dtype=np.float64).reshape(B, -1)
    w_np = np.asarray(weight, dtype=np.float64)
    b_np = np.asarray(bias, dtype=np.float64)
    logits = xf @ w_np.T + b_np
    e = np.exp(logits - logits.max(axis=0, keepdims=True))
    ref = e / e.sum(axis=0, keepdims=True)
    np.testing.assert_allclose(np.asarray(out), ref, rtol=1e-4, atol=1e-4)

    print("KERNEL_OK")
</pallas_src>

<mosaic_0001>
module attributes {stable_mosaic.version = 11 : i64} {
  func.func @_detective_kernel(%arg0: memref<2x384x128xf32, #tpu.memory_space<vmem>>, %arg1: memref<3x384x128xf32, #tpu.memory_space<vmem>>, %arg2: memref<1x3xf32, #tpu.memory_space<vmem>>, %arg3: memref<2x3xf32, #tpu.memory_space<vmem>>) attributes {dimension_semantics = [], scalar_prefetch = 0 : i64, scratch_operands = 0 : i64, tpu.core_type = #tpu.core_type<tc>} {
    %0 = tpu.iota {dimensions = array<i32: 0>} : vector<2x3xi32>
    %1 = tpu.iota {dimensions = array<i32: 1>} : vector<2x3xi32>
    %cst = arith.constant 0.000000e+00 : f32
    %2 = vector.broadcast %cst : f32 to vector<2x3xf32>
    %c0 = arith.constant 0 : index
    %c0_0 = arith.constant 0 : index
    %c0_1 = arith.constant 0 : index
    %3 = vector.load %arg0[%c0, %c0_0, %c0_1] : memref<2x384x128xf32, #tpu.memory_space<vmem>>, vector<1x384x128xf32>
    %4 = vector.shape_cast %3 : vector<1x384x128xf32> to vector<384x128xf32>
    %c0_2 = arith.constant 0 : index
    %c0_3 = arith.constant 0 : index
    %c0_4 = arith.constant 0 : index
    %5 = vector.load %arg1[%c0_2, %c0_3, %c0_4] : memref<3x384x128xf32, #tpu.memory_space<vmem>>, vector<1x384x128xf32>
    %6 = vector.shape_cast %5 : vector<1x384x128xf32> to vector<384x128xf32>
    %7 = arith.mulf %4, %6 : vector<384x128xf32>
    %8 = vector.shape_cast %7 : vector<384x128xf32> to vector<1x384x128xf32>
    %cst_5 = arith.constant dense<0.000000e+00> : vector<1xf32>
    %9 = vector.multi_reduction <add>, %8, %cst_5 [1, 2] : vector<1x384x128xf32> to vector<1xf32>
    %10 = vector.shape_cast %9 : vector<1xf32> to vector<1x1x1xf32>
    %11 = vector.extract %10[0, 0, 0] : f32 from vector<1x1x1xf32>
    %c0_i32 = arith.constant 0 : i32
    %12 = vector.broadcast %c0_i32 : i32 to vector<2x3xi32>
    %13 = arith.cmpi eq, %0, %12 : vector<2x3xi32>
    %c0_i32_6 = arith.constant 0 : i32
    %14 = vector.broadcast %c0_i32_6 : i32 to vector<2x3xi32>
    %15 = arith.cmpi eq, %1, %14 : vector<2x3xi32>
    %16 = arith.andi %13, %15 : vector<2x3xi1>
    %17 = vector.broadcast %11 : f32 to vector<2x3xf32>
    %18 = arith.select %16, %17, %2 : vector<2x3xi1>, vector<2x3xf32>
    %c1 = arith.constant 1 : index
    %c0_7 = arith.constant 0 : index
    %c0_8 = arith.constant 0 : index
    %19 = vector.load %arg1[%c1, %c0_7, %c0_8] : memref<3x384x128xf32, #tpu.memory_space<vmem>>, vector<1x384x128xf32>
    %20 = vector.shape_cast %19 : vector<1x384x128xf32> to vector<384x128xf32>
    %21 = arith.mulf %4, %20 : vector<384x128xf32>
    %22 = vector.shape_cast %21 : vector<384x128xf32> to vector<1x384x128xf32>
    %cst_9 = arith.constant dense<0.000000e+00> : vector<1xf32>
    %23 = vector.multi_reduction <add>, %22, %cst_9 [1, 2] : vector<1x384x128xf32> to vector<1xf32>
    %24 = vector.shape_cast %23 : vector<1xf32> to vector<1x1x1xf32>
    %25 = vector.extract %24[0, 0, 0] : f32 from vector<1x1x1xf32>
    %c0_i32_10 = arith.constant 0 : i32
    %26 = vector.broadcast %c0_i32_10 : i32 to vector<2x3xi32>
    %27 = arith.cmpi eq, %0, %26 : vector<2x3xi32>
    %c1_i32 = arith.constant 1 : i32
    %28 = vector.broadcast %c1_i32 : i32 to vector<2x3xi32>
    %29 = arith.cmpi eq, %1, %28 : vector<2x3xi32>
    %30 = arith.andi %27, %29 : vector<2x3xi1>
    %31 = vector.broadcast %25 : f32 to vector<2x3xf32>
    %32 = arith.select %30, %31, %18 : vector<2x3xi1>, vector<2x3xf32>
    %c2 = arith.constant 2 : index
    %c0_11 = arith.constant 0 : index
    %c0_12 = arith.constant 0 : index
    %33 = vector.load %arg1[%c2, %c0_11, %c0_12] : memref<3x384x128xf32, #tpu.memory_space<vmem>>, vector<1x384x128xf32>
    %34 = vector.shape_cast %33 : vector<1x384x128xf32> to vector<384x128xf32>
    %35 = arith.mulf %4, %34 : vector<384x128xf32>
    %36 = vector.shape_cast %35 : vector<384x128xf32> to vector<1x384x128xf32>
    %cst_13 = arith.constant dense<0.000000e+00> : vector<1xf32>
    %37 = vector.multi_reduction <add>, %36, %cst_13 [1, 2] : vector<1x384x128xf32> to vector<1xf32>
    %38 = vector.shape_cast %37 : vector<1xf32> to vector<1x1x1xf32>
    %39 = vector.extract %38[0, 0, 0] : f32 from vector<1x1x1xf32>
    %c0_i32_14 = arith.constant 0 : i32
    %40 = vector.broadcast %c0_i32_14 : i32 to vector<2x3xi32>
    %41 = arith.cmpi eq, %0, %40 : vector<2x3xi32>
    %c2_i32 = arith.constant 2 : i32
    %42 = vector.broadcast %c2_i32 : i32 to vector<2x3xi32>
    %43 = arith.cmpi eq, %1, %42 : vector<2x3xi32>
    %44 = arith.andi %41, %43 : vector<2x3xi1>
    %45 = vector.broadcast %39 : f32 to vector<2x3xf32>
    %46 = arith.select %44, %45, %32 : vector<2x3xi1>, vector<2x3xf32>
    %c1_15 = arith.constant 1 : index
    %c0_16 = arith.constant 0 : index
    %c0_17 = arith.constant 0 : index
    %47 = vector.load %arg0[%c1_15, %c0_16, %c0_17] : memref<2x384x128xf32, #tpu.memory_space<vmem>>, vector<1x384x128xf32>
    %48 = vector.shape_cast %47 : vector<1x384x128xf32> to vector<384x128xf32>
    %c0_18 = arith.constant 0 : index
    %c0_19 = arith.constant 0 : index
    %c0_20 = arith.constant 0 : index
    %49 = vector.load %arg1[%c0_18, %c0_19, %c0_20] : memref<3x384x128xf32, #tpu.memory_space<vmem>>, vector<1x384x128xf32>
    %50 = vector.shape_cast %49 : vector<1x384x128xf32> to vector<384x128xf32>
    %51 = arith.mulf %48, %50 : vector<384x128xf32>
    %52 = vector.shape_cast %51 : vector<384x128xf32> to vector<1x384x128xf32>
    %cst_21 = arith.constant dense<0.000000e+00> : vector<1xf32>
    %53 = vector.multi_reduction <add>, %52, %cst_21 [1, 2] : vector<1x384x128xf32> to vector<1xf32>
    %54 = vector.shape_cast %53 : vector<1xf32> to vector<1x1x1xf32>
    %55 = vector.extract %54[0, 0, 0] : f32 from vector<1x1x1xf32>
    %c1_i32_22 = arith.constant 1 : i32
    %56 = vector.broadcast %c1_i32_22 : i32 to vector<2x3xi32>
    %57 = arith.cmpi eq, %0, %56 : vector<2x3xi32>
    %c0_i32_23 = arith.constant 0 : i32
    %58 = vector.broadcast %c0_i32_23 : i32 to vector<2x3xi32>
    %59 = arith.cmpi eq, %1, %58 : vector<2x3xi32>
    %60 = arith.andi %57, %59 : vector<2x3xi1>
    %61 = vector.broadcast %55 : f32 to vector<2x3xf32>
    %62 = arith.select %60, %61, %46 : vector<2x3xi1>, vector<2x3xf32>
    %c1_24 = arith.constant 1 : index
    %c0_25 = arith.constant 0 : index
    %c0_26 = arith.constant 0 : index
    %63 = vector.load %arg1[%c1_24, %c0_25, %c0_26] : memref<3x384x128xf32, #tpu.memory_space<vmem>>, vector<1x384x128xf32>
    %64 = vector.shape_cast %63 : vector<1x384x128xf32> to vector<384x128xf32>
    %65 = arith.mulf %48, %64 : vector<384x128xf32>
    %66 = vector.shape_cast %65 : vector<384x128xf32> to vector<1x384x128xf32>
    %cst_27 = arith.constant dense<0.000000e+00> : vector<1xf32>
    %67 = vector.multi_reduction <add>, %66, %cst_27 [1, 2] : vector<1x384x128xf32> to vector<1xf32>
    %68 = vector.shape_cast %67 : vector<1xf32> to vector<1x1x1xf32>
    %69 = vector.extract %68[0, 0, 0] : f32 from vector<1x1x1xf32>
    %c1_i32_28 = arith.constant 1 : i32
    %70 = vector.broadcast %c1_i32_28 : i32 to vector<2x3xi32>
    %71 = arith.cmpi eq, %0, %70 : vector<2x3xi32>
    %c1_i32_29 = arith.constant 1 : i32
    %72 = vector.broadcast %c1_i32_29 : i32 to vector<2x3xi32>
    %73 = arith.cmpi eq, %1, %72 : vector<2x3xi32>
    %74 = arith.andi %71, %73 : vector<2x3xi1>
    %75 = vector.broadcast %69 : f32 to vector<2x3xf32>
    %76 = arith.select %74, %75, %62 : vector<2x3xi1>, vector<2x3xf32>
    %c2_30 = arith.constant 2 : index
    %c0_31 = arith.constant 0 : index
    %c0_32 = arith.constant 0 : index
    %77 = vector.load %arg1[%c2_30, %c0_31, %c0_32] : memref<3x384x128xf32, #tpu.memory_space<vmem>>, vector<1x384x128xf32>
    %78 = vector.shape_cast %77 : vector<1x384x128xf32> to vector<384x128xf32>
    %79 = arith.mulf %48, %78 : vector<384x128xf32>
    %80 = vector.shape_cast %79 : vector<384x128xf32> to vector<1x384x128xf32>
    %cst_33 = arith.constant dense<0.000000e+00> : vector<1xf32>
    %81 = vector.multi_reduction <add>, %80, %cst_33 [1, 2] : vector<1x384x128xf32> to vector<1xf32>
    %82 = vector.shape_cast %81 : vector<1xf32> to vector<1x1x1xf32>
    %83 = vector.extract %82[0, 0, 0] : f32 from vector<1x1x1xf32>
    %c1_i32_34 = arith.constant 1 : i32
    %84 = vector.broadcast %c1_i32_34 : i32 to vector<2x3xi32>
    %85 = arith.cmpi eq, %0, %84 : vector<2x3xi32>
    %c2_i32_35 = arith.constant 2 : i32
    %86 = vector.broadcast %c2_i32_35 : i32 to vector<2x3xi32>
    %87 = arith.cmpi eq, %1, %86 : vector<2x3xi32>
    %88 = arith.andi %85, %87 : vector<2x3xi1>
    %89 = vector.broadcast %83 : f32 to vector<2x3xf32>
    %90 = arith.select %88, %89, %76 : vector<2x3xi1>, vector<2x3xf32>
    %c0_36 = arith.constant 0 : index
    %c0_37 = arith.constant 0 : index
    %91 = vector.load %arg2[%c0_36, %c0_37] : memref<1x3xf32, #tpu.memory_space<vmem>>, vector<1x3xf32>
    %92 = vector.broadcast %91 : vector<1x3xf32> to vector<2x3xf32>
    %93 = arith.addf %90, %92 : vector<2x3xf32>
    %cst_38 = arith.constant dense<0xFF800000> : vector<3xf32>
    %94 = vector.multi_reduction <maximumf>, %93, %cst_38 [0] : vector<2x3xf32> to vector<3xf32>
    %95 = vector.shape_cast %94 : vector<3xf32> to vector<1x3xf32>
    %96 = vector.broadcast %95 : vector<1x3xf32> to vector<2x3xf32>
    %97 = arith.subf %93, %96 : vector<2x3xf32>
    %98 = math.exp %97 : vector<2x3xf32>
    %cst_39 = arith.constant dense<0.000000e+00> : vector<3xf32>
    %99 = vector.multi_reduction <add>, %98, %cst_39 [0] : vector<2x3xf32> to vector<3xf32>
    %100 = vector.shape_cast %99 : vector<3xf32> to vector<1x3xf32>
    %101 = tpu.reciprocal %100 : vector<1x3xf32> -> vector<1x3xf32>
    %102 = vector.broadcast %101 : vector<1x3xf32> to vector<2x3xf32>
    %103 = arith.mulf %98, %102 : vector<2x3xf32>
    %c0_40 = arith.constant 0 : index
    %c0_41 = arith.constant 0 : index
    %104 = vector.load %arg3[%c0_40, %c0_41] : memref<2x3xf32, #tpu.memory_space<vmem>>, vector<2x3xf32>
    tpu.vector_store %arg3[%c0_40, %c0_41], %103 {strides = array<i32>} : memref<2x3xf32, #tpu.memory_space<vmem>>, vector<2x3xf32>,
    return
  }
}

</mosaic_0001>

<bundles_post_ra>
// kernel: tpu_custom_call.1
= control target key start
LH: loop header
LB: loop body
LE: loop exit
PB: predicated region body
PF: predicated region fallthrough
CT: control target
= control target key end

     0   :  { %8 = vsyncpa [#allocation3], 0  ;;  %s2086_s0 = inlined_call_operand.hbm [shape: f32[2,384,128], index: 0, kind: input, shape index: {}]   ;;  %s2087_s1 = inlined_call_operand.hbm [shape: f32[3,384,128], index: 1, kind: input, shape index: {}]   ;;  %s2088_s2 = inlined_call_operand.vmem [shape: f32[1,3], index: 2, kind: input, shape index: {}]   ;;  %s2089_s3 = inlined_call_operand.hbm [shape: f32[2,3], index: 3, kind: output, shape index: {}]  }
   0x1   :  { %9 = vsyncpa [#allocation6], 0 }
   0x2   :  { %10 = vsyncpa [#allocation4], 0  ;;  %s15_s14 = sshll.u32 %s2086_s0, 4  ;;  %s1168_s15 = smov [#allocation2]   ;;  %s16_s14 = int_to_ptr.hbm [resolvable:$true] %s15_s14 }
   0x3   :  { %s17_s16 = sshll.u32 %s1168_s15, 4  ;;  %s28_s19 = sshll.u32 %s2087_s1, 4  ;;  %s18_s16 = int_to_ptr.vmem [resolvable:$true] %s17_s16  ;;  %s29_s19 = int_to_ptr.hbm [resolvable:$true] %s28_s19 }
   0x4   :  { %s1169_s20 = smov 128   ;;  %s1170_s21 = smov 8  }
   0x5   :  { %23 = dma.hbm_to_vmem [thread:$0]  %s16_s14, 12288, %s18_s16, [#allocation3], %s1169_s20, %s1169_s20, %s1170_s21  }
   0x6   :  { %s1171_s22 = smov [#allocation5]  }
   0x7   :  { %s30_s23 = sshll.u32 %s1171_s22, 4  ;;  %s31_s23 = int_to_ptr.vmem [resolvable:$true] %s30_s23 }
   0x8   :  { %36 = dma.hbm_to_vmem [thread:$0]  %s29_s19, 18432, %s31_s23, [#allocation6], %s1169_s20, %s1169_s20, %s1170_s21  }
   0x9   :  { %1162 = dma.done.wait [#allocation3], 12288  }
   0xa   :  { %1163 = vsyncadd [#allocation3], 4294955008 }
   0xb   :  { %1164 = dma.done.wait [#allocation6], 18432  }
   0xc   :  { %1165 = vsyncadd [#allocation6], 4294948864  ;;  %v257_v0 = vld [vmem:[#allocation5 + $0x180] sm:$0xff]  ;;  %v258_v1 = vld [vmem:[#allocation5 + $0x188] sm:$0xff]  ;;  %vm946_vm11 = vcmask 17408   ;;  %s987_s6 = sshll.u32 %s2089_s3, 4  ;;  %s988_s6 = int_to_ptr.hbm [resolvable:$true] %s987_s6 }
   0xd   :  { %v259_v2 = vld [vmem:[#allocation5 + $0x190] sm:$0xff]  ;;  %v260_v3 = vld [vmem:[#allocation5 + $0x198] sm:$0xff]  ;;  %v1199_v4 = vld [vmem:[#allocation2 + $0x180] sm:$0xff] }
   0xe   :  { %2228 = vst [vmem:[#allocation11_spill] sm:$0xff] %v1199_v4  ;;  %v1201_v5 = vld [vmem:[#allocation2 + $0x188] sm:$0xff]  ;;  %v1203_v6 = vld [vmem:[#allocation2 + $0x190] sm:$0xff]  ;;  %v1205_v7 = vld [vmem:[#allocation2 + $0x198] sm:$0xff]  ;;  %v727_v8 = vmul.f32 %v1199_v4, %v257_v0 }
   0xf   :  { %2229 = vst [vmem:[#allocation12_spill] sm:$0xff] %v1203_v6  ;;  %v728_v9 = vmul.f32 %v1201_v5, %v258_v1  ;;  %v729_v10 = vmul.f32 %v1203_v6, %v259_v2  ;;  %v261_v11 = vld [vmem:[#allocation5 + $0x1a0] sm:$0xff]  ;;  %v730_v13 = vmul.f32 %v1205_v7, %v260_v3  ;;  %v262_v15 = vld [vmem:[#allocation5 + $0x1a8] sm:$0xff]  ;;  %v263_v19 = vld [vmem:[#allocation5 + $0x1b0] sm:$0xff] }
  0x10   :  { %2230 = vst [vmem:[#allocation13_spill] sm:$0xff] %v1205_v7  ;;  %v1210_v12 = vld [vmem:[#allocation2 + $0x1a0] sm:$0xff]  ;;  %v1213_v16 = vld [vmem:[#allocation2 + $0x1a8] sm:$0xff]  ;;  %v1216_v20 = vld [vmem:[#allocation2 + $0x1b0] sm:$0xff] }
  0x11   :  { %v775_v14 = vadd.f32 %v728_v9, %v727_v8  ;;  %v731_v17 = vmul.f32 %v1210_v12, %v261_v11  ;;  %v732_v21 = vmul.f32 %v1213_v16, %v262_v15  ;;  %v264_v23 = vld [vmem:[#allocation5 + $0x1b8] sm:$0xff]  ;;  %v733_v25 = vmul.f32 %v1216_v20, %v263_v19  ;;  %v265_v27 = vld [vmem:[#allocation5 + $0x1c0] sm:$0xff]  ;;  %v266_v31 = vld [vmem:[#allocation5 + $0x1c8] sm:$0xff] }
  0x12   :  { %v1219_v24 = vld [vmem:[#allocation2 + $0x1b8] sm:$0xff]  ;;  %v1222_v28 = vld [vmem:[#allocation2 + $0x1c0] sm:$0xff]  ;;  %v1225_v32 = vld [vmem:[#allocation2 + $0x1c8] sm:$0xff] }
  0x13   :  { %v776_v18 = vadd.f32 %v775_v14, %v729_v10  ;;  %v734_v29 = vmul.f32 %v1219_v24, %v264_v23  ;;  %v735_v33 = vmul.f32 %v1222_v28, %v265_v27  ;;  %v267_v35 = vld [vmem:[#allocation5 + $0x1d0] sm:$0xff]  ;;  %v736_v37 = vmul.f32 %v1225_v32, %v266_v31  ;;  %v268_v39 = vld [vmem:[#allocation5 + $0x1d8] sm:$0xff]  ;;  %v269_v43 = vld [vmem:[#allocation5 + $0x1e0] sm:$0xff] }
  0x14   :  { %v1228_v36 = vld [vmem:[#allocation2 + $0x1d0] sm:$0xff]  ;;  %v1231_v40 = vld [vmem:[#allocation2 + $0x1d8] sm:$0xff]  ;;  %v1234_v44 = vld [vmem:[#allocation2 + $0x1e0] sm:$0xff] }
  0x15   :  { %v777_v22 = vadd.f32 %v776_v18, %v730_v13  ;;  %v737_v41 = vmul.f32 %v1228_v36, %v267_v35  ;;  %v738_v45 = vmul.f32 %v1231_v40, %v268_v39  ;;  %v270_v47 = vld [vmem:[#allocation5 + $0x1e8] sm:$0xff]  ;;  %v739_v49 = vmul.f32 %v1234_v44, %v269_v43  ;;  %v51_v51 = vld [vmem:[#allocation2] sm:$0xff]  ;;  %v53_v53 = vld [vmem:[#allocation2 + $0x10] sm:$0xff] }
  0x16   :  { %v1237_v48 = vld [vmem:[#allocation2 + $0x1e8] sm:$0xff]  ;;  %v271_v54 = vld [vmem:[#allocation5 + $0x1f0] sm:$0xff]  ;;  %v1242_v56 = vld [vmem:[#allocation2 + $0x18] sm:$0xff] }
  0x17   :  { %v778_v26 = vadd.f32 %v777_v22, %v731_v17  ;;  %v52_v52 = vld [vmem:[#allocation2 + $0x8] sm:$0xff]  ;;  %v1240_v55 = vld [vmem:[#allocation2 + $0x1f0] sm:$0xff]  ;;  %v740_v57 = vmul.f32 %v1237_v48, %v270_v47  ;;  %v1245_v59 = vld [vmem:[#allocation5 + $0x300] sm:$0xff] }
  0x18   :  { %2231 = vst [vmem:[#allocation14_spill] sm:$0xff] %v1240_v55  ;;  %v1247_v60 = vld [vmem:[#allocation5 + $0x308] sm:$0xff]  ;;  %v1249_v61 = vld [vmem:[#allocation5 + $0x310] sm:$0xff]  ;;  %v272_v62 = vld [vmem:[#allocation5 + $0x1f8] sm:$0xff]  ;;  %v462_v1 = vmul.f32 %v1245_v59, %v51_v51  ;;  %v741_v8 = vmul.f32 %v1240_v55, %v271_v54 }
  0x19   :  { %v779_v30 = vadd.f32 %v778_v26, %v732_v21  ;;  %v1251_v63 = vld [vmem:[#allocation2 + $0x1f8] sm:$0xff]  ;;  %v463_v2 = vmul.f32 %v1247_v60, %v52_v52  ;;  %v464_v3 = vmul.f32 %v1249_v61, %v53_v53  ;;  %v55_v10 = vld [vmem:[#allocation2 + $0x20] sm:$0xff]  ;;  %v1266_v21 = vld [vmem:[#allocation2 + $0x28] sm:$0xff] }
  0x1a   :  { %2232 = vst [vmem:[#allocation15_spill] sm:$0xff] %v1251_v63  ;;  %v1253_v0 = vld [vmem:[#allocation5 + $0x318] sm:$0xff]  ;;  %v1259_v11 = vld [vmem:[#allocation5 + $0x320] sm:$0xff]  ;;  %v742_v18 = vmul.f32 %v1251_v63, %v272_v62  ;;  %v1268_v22 = vld [vmem:[#allocation5 + $0x328] sm:$0xff] }
  0x1b   :  { %v780_v34 = vadd.f32 %v779_v30, %v733_v25  ;;  %v273_v13 = vld [vmem:[#allocation5 + $0x200] sm:$0xff]  ;;  %v465_v15 = vmul.f32 %v1253_v0, %v1242_v56  ;;  %v510_v17 = vadd.f32 %v463_v2, %v462_v1  ;;  %v274_v23 = vld [vmem:[#allocation5 + $0x208] sm:$0xff]  ;;  %v466_v26 = vmul.f32 %v1259_v11, %v55_v10  ;;  %v1274_v31 = vld [vmem:[#allocation2 + $0x30] sm:$0xff] }
  0x1c   :  { %v1261_v14 = vld [vmem:[#allocation2 + $0x200] sm:$0xff]  ;;  %v1270_v25 = vld [vmem:[#allocation2 + $0x208] sm:$0xff]  ;;  %v276_v35 = vld [vmem:[#allocation5 + $0x218] sm:$0xff] }
  0x1d   :  { %v781_v38 = vadd.f32 %v780_v34, %v734_v29  ;;  %2233 = vst [vmem:[#allocation16_spill] sm:$0xff] %v1261_v14  ;;  %v511_v27 = vadd.f32 %v510_v17, %v464_v3  ;;  %v743_v29 = vmul.f32 %v1261_v14, %v273_v13  ;;  %v275_v34 = vld [vmem:[#allocation5 + $0x210] sm:$0xff]  ;;  %v1283_v43 = vld [vmem:[#allocation2 + $0x38] sm:$0xff]  ;;  %v1293_v54 = vld [vmem:[#allocation5 + $0x8] sm:$0xff] }
  0x1e   :  { %2234 = vst [vmem:[#allocation17_spill] sm:$0xff] %v1270_v25  ;;  %v1289_v47 = vld [vmem:[#allocation2 + $0x218] sm:$0xff]  ;;  %v1299_v2 = vld [vmem:[#allocation2 + $0x40] sm:$0xff] }
  0x1f   :  { %v782_v42 = vadd.f32 %v781_v38, %v735_v33  ;;  %v1276_v33 = vld [vmem:[#allocation5 + $0x330] sm:$0xff]  ;;  %v467_v38 = vmul.f32 %v1268_v22, %v1266_v21  ;;  %v512_v39 = vadd.f32 %v511_v27, %v465_v15  ;;  %2237 = vst [vmem:[#allocation20_spill] sm:$0xff] %v1289_v47  ;;  %v1301_v3 = vld [vmem:[#allocation5 + $0x340] sm:$0xff]  ;;  %v1314_v27 = vld [vmem:[#allocation2 + $0x48] sm:$0xff] }
  0x20   :  { %2238 = vst [vmem:[#allocation21_spill] sm:$0xff] %v1293_v54  ;;  %v277_v15 = vld [vmem:[#allocation5 + $0x220] sm:$0xff]  ;;  %v1390_v14 = vld [vmem:[#allocation2 + $0x258] sm:$0xff] }
  0x21   :  { %v783_v46 = vadd.f32 %v782_v42, %v736_v37  ;;  %v1278_v37 = vld [vmem:[#allocation2 + $0x210] sm:$0xff]  ;;  %v1307_v17 = vld [vmem:[#allocation2 + $0x220] sm:$0xff]  ;;  %2257 = vst [vmem:[#allocation40_spill] sm:$0xff] %v1390_v14 }
  0x22   :  { %2235 = vst [vmem:[#allocation18_spill] sm:$0xff] %v1278_v37  ;;  %v745_v62 = vmul.f32 %v1278_v37, %v275_v34  ;;  %v1320_v34 = vld [vmem:[#allocation2 + $0x228] sm:$0xff]  ;;  %v283_v37 = vld [vmem:[#allocation5 + $0x250] sm:$0xff]  ;;  %v1403_v63 = vld [vmem:[#allocation2 + $0x260] sm:$0xff] }
  0x23   :  { %v784_v50 = vadd.f32 %v783_v46, %v737_v41  ;;  %v744_v41 = vmul.f32 %v1270_v25, %v274_v23  ;;  %v1287_v46 = vld [vmem:[#allocation5] sm:$0xff]  ;;  %2241 = vst [vmem:[#allocation24_spill] sm:$0xff] %v1307_v17  ;;  %v746_v23 = vmul.f32 %v1289_v47, %v276_v35  ;;  %v747_v35 = vmul.f32 %v1307_v17, %v277_v15  ;;  %v1388_v25 = vld [vmem:[#allocation5 + $0x50] sm:$0xff] }
  0x24   :  { %2236 = vst [vmem:[#allocation19_spill] sm:$0xff] %v1287_v46  ;;  %v1415_v55 = vld [vmem:[#allocation5 + $0x60] sm:$0xff] }
  0x25   :  { %v785_v58 = vadd.f32 %v784_v50, %v738_v45  ;;  %v1285_v45 = vld [vmem:[#allocation5 + $0x338] sm:$0xff]  ;;  %v513_v50 = vadd.f32 %v512_v39, %v466_v26  ;;  %2243 = vst [vmem:[#allocation26_spill] sm:$0xff] %v1320_v34  ;;  %v470_v39 = vmul.f32 %v1301_v3, %v1299_v2 }
  0x26   :  { %2256 = vst [vmem:[#allocation39_spill] sm:$0xff] %v1388_v25 }
  0x27   :  { %v786_v9 = vadd.f32 %v785_v58, %v739_v49  ;;  %v468_v49 = vmul.f32 %v1276_v33, %v1274_v31  ;;  %v147_v58 = vmul.f32 %v1287_v46, %v51_v51  ;;  %v514_v51 = vadd.f32 %v513_v50, %v467_v38  ;;  %v1327_v50 = vld [vmem:[#allocation2 + $0x50] sm:$0xff]  ;;  %2260 = vst [vmem:[#allocation43_spill] sm:$0xff] %v1403_v63 }
  0x28   :  { %2262 = vst [vmem:[#allocation45_spill] sm:$0xff] %v1415_v55 }
  0x29   :  { %v787_v19 = vadd.f32 %v786_v9, %v740_v57  ;;  %v1295_v57 = vld [vmem:[#allocation5 + $0x10] sm:$0xff]  ;;  %v148_v9 = vmul.f32 %v1293_v54, %v52_v52  ;;  %v515_v38 = vadd.f32 %v514_v51, %v468_v49 }
  0x2a   :  { %2239 = vst [vmem:[#allocation22_spill] sm:$0xff] %v1295_v57  ;;  %v149_v13 = vmul.f32 %v1295_v57, %v53_v53  ;;  %v1336_v49 = vld [vmem:[#allocation5 + $0x30] sm:$0xff] }
  0x2b   :  { %v788_v30 = vadd.f32 %v787_v19, %v741_v8  ;;  %v1303_v8 = vld [vmem:[#allocation5 + $0x18] sm:$0xff]  ;;  %v1311_v19 = vld [vmem:[#allocation5 + $0x20] sm:$0xff]  ;;  %v195_v53 = vadd.f32 %v148_v9, %v147_v58  ;;  %v279_v58 = vld [vmem:[#allocation5 + $0x230] sm:$0xff]  ;;  %2246 = vst [vmem:[#allocation29_spill] sm:$0xff] %v1336_v49 }
  0x2c   :  { %2240 = vst [vmem:[#allocation23_spill] sm:$0xff] %v1303_v8  ;;  %v150_v52 = vmul.f32 %v1303_v8, %v1242_v56  ;;  %v151_v57 = vmul.f32 %v1311_v19, %v55_v10  ;;  %v1332_v9 = vld [vmem:[#allocation2 + $0x230] sm:$0xff] }
  0x2d   :  { %v789_v42 = vadd.f32 %v788_v30, %v742_v18  ;;  %v469_v18 = vmul.f32 %v1285_v45, %v1283_v43  ;;  %2242 = vst [vmem:[#allocation25_spill] sm:$0xff] %v1311_v19  ;;  %v278_v30 = vld [vmem:[#allocation5 + $0x228] sm:$0xff]  ;;  %v196_v56 = vadd.f32 %v195_v53, %v149_v13  ;;  %v280_v53 = vld [vmem:[#allocation5 + $0x238] sm:$0xff] }
  0x2e   :  { %2245 = vst [vmem:[#allocation28_spill] sm:$0xff] %v1332_v9  ;;  %v748_v51 = vmul.f32 %v1320_v34, %v278_v30  ;;  %v1345_v19 = vld [vmem:[#allocation2 + $0x238] sm:$0xff]  ;;  %v749_v30 = vmul.f32 %v1332_v9, %v279_v58  ;;  %v1354_v34 = vld [vmem:[#allocation5 + $0x360] sm:$0xff]  ;;  %v1367_v9 = vld [vmem:[#allocation5 + $0x368] sm:$0xff] }
  0x2f   :  { %v790_v1 = vadd.f32 %v789_v42, %v743_v29  ;;  %v1316_v29 = vld [vmem:[#allocation5 + $0x348] sm:$0xff]  ;;  %v516_v54 = vadd.f32 %v515_v38, %v469_v18  ;;  %v197_v13 = vadd.f32 %v196_v56, %v150_v52  ;;  %2247 = vst [vmem:[#allocation30_spill] sm:$0xff] %v1345_v19  ;;  %v1349_v38 = vld [vmem:[#allocation5 + $0x38] sm:$0xff]  ;;  %v281_v56 = vld [vmem:[#allocation5 + $0x240] sm:$0xff]  ;;  %v750_v58 = vmul.f32 %v1345_v19, %v280_v53 }
  0x30   :  { %v1324_v42 = vld [vmem:[#allocation5 + $0x28] sm:$0xff]  ;;  %v471_v8 = vmul.f32 %v1316_v29, %v1314_v27  ;;  %2248 = vst [vmem:[#allocation31_spill] sm:$0xff] %v1349_v38  ;;  %v1380_v19 = vld [vmem:[#allocation5 + $0x370] sm:$0xff] }
  0x31   :  { %v791_v26 = vadd.f32 %v790_v1, %v744_v41  ;;  %2244 = vst [vmem:[#allocation27_spill] sm:$0xff] %v1324_v42  ;;  %v1329_v1 = vld [vmem:[#allocation5 + $0x350] sm:$0xff]  ;;  %v152_v10 = vmul.f32 %v1324_v42, %v1266_v21  ;;  %v517_v18 = vadd.f32 %v516_v54, %v470_v39  ;;  %v153_v21 = vmul.f32 %v1336_v49, %v1274_v31  ;;  %v1358_v42 = vld [vmem:[#allocation2 + $0x240] sm:$0xff]  ;;  %v1371_v49 = vld [vmem:[#allocation2 + $0x248] sm:$0xff] }
  0x32   :  { %v472_v46 = vmul.f32 %v1329_v1, %v1327_v50  ;;  %v198_v52 = vadd.f32 %v197_v13, %v151_v57  ;;  %2249 = vst [vmem:[#allocation32_spill] sm:$0xff] %v1358_v42  ;;  %v1362_v39 = vld [vmem:[#allocation5 + $0x40] sm:$0xff]  ;;  %v154_v31 = vmul.f32 %v1349_v38, %v1283_v43  ;;  %v282_v13 = vld [vmem:[#allocation5 + $0x248] sm:$0xff]  ;;  %v1384_v38 = vld [vmem:[#allocation2 + $0x250] sm:$0xff] }
  0x33   :  { %v792_v41 = vadd.f32 %v791_v26, %v745_v62  ;;  %v1339_v62 = vld [vmem:[#allocation2 + $0x58] sm:$0xff]  ;;  %v518_v54 = vadd.f32 %v517_v18, %v471_v8  ;;  %2250 = vst [vmem:[#allocation33_spill] sm:$0xff] %v1362_v39  ;;  %v1375_v18 = vld [vmem:[#allocation5 + $0x48] sm:$0xff]  ;;  %v155_v43 = vmul.f32 %v1362_v39, %v1299_v2 }
  0x34   :  { %v1341_v26 = vld [vmem:[#allocation5 + $0x358] sm:$0xff]  ;;  %v199_v57 = vadd.f32 %v198_v52, %v152_v10  ;;  %2251 = vst [vmem:[#allocation34_spill] sm:$0xff] %v1371_v49  ;;  %v156_v2 = vmul.f32 %v1375_v18, %v1314_v27  ;;  %v157_v27 = vmul.f32 %v1388_v25, %v1327_v50  ;;  %v1432_v25 = vld [vmem:[#allocation5 + $0x68] sm:$0xff] }
  0x35   :  { %v793_v15 = vadd.f32 %v792_v41, %v746_v23  ;;  %v1352_v41 = vld [vmem:[#allocation2 + $0x60] sm:$0xff]  ;;  %v473_v17 = vmul.f32 %v1341_v26, %v1339_v62  ;;  %v519_v8 = vadd.f32 %v518_v54, %v472_v46  ;;  %2252 = vst [vmem:[#allocation35_spill] sm:$0xff] %v1375_v18  ;;  %v284_v52 = vld [vmem:[#allocation5 + $0x258] sm:$0xff] }
  0x36   :  { %v474_v47 = vmul.f32 %v1354_v34, %v1352_v41  ;;  %2254 = vst [vmem:[#allocation37_spill] sm:$0xff] %v1380_v19  ;;  %v200_v10 = vadd.f32 %v199_v57, %v153_v21  ;;  %v285_v57 = vld [vmem:[#allocation5 + $0x260] sm:$0xff]  ;;  %v754_v18 = vmul.f32 %v1390_v14, %v284_v52  ;;  %v835_v52 = vmul.f32 %v1201_v5, %v1247_v60  ;;  %v1436_v14 = vld [vmem:[#allocation2 + $0x90] sm:$0xff] }
  0x37   :  { %v794_v23 = vadd.f32 %v793_v15, %v747_v35  ;;  %v1365_v15 = vld [vmem:[#allocation2 + $0x68] sm:$0xff]  ;;  %2255 = vst [vmem:[#allocation38_spill] sm:$0xff] %v1384_v38  ;;  %v520_v54 = vadd.f32 %v519_v8, %v473_v17  ;;  %v1401_v8 = vld [vmem:[#allocation5 + $0x58] sm:$0xff] }
  0x38   :  { %v475_v46 = vmul.f32 %v1367_v9, %v1365_v15  ;;  %v201_v21 = vadd.f32 %v200_v10, %v154_v31  ;;  %2259 = vst [vmem:[#allocation42_spill] sm:$0xff] %v1401_v8  ;;  %v286_v10 = vld [vmem:[#allocation5 + $0x268] sm:$0xff]  ;;  %v158_v50 = vmul.f32 %v1401_v8, %v1339_v62  ;;  %v159_v62 = vmul.f32 %v1415_v55, %v1352_v41  ;;  %v1447_v8 = vld [vmem:[#allocation5 + $0x70] sm:$0xff]  ;;  %v1453_v41 = vld [vmem:[#allocation2 + $0x98] sm:$0xff] }
  0x39   :  { %v795_v35 = vadd.f32 %v794_v23, %v748_v51  ;;  %v751_v51 = vmul.f32 %v1358_v42, %v281_v56  ;;  %v1378_v23 = vld [vmem:[#allocation2 + $0x70] sm:$0xff]  ;;  %v1395_v42 = vld [vmem:[#allocation5 + $0x378] sm:$0xff]  ;;  %v521_v17 = vadd.f32 %v520_v54, %v474_v47  ;;  %2265 = vst [vmem:[#allocation48_spill] sm:$0xff] %v1432_v25  ;;  %v289_v55 = vld [vmem:[#allocation5 + $0x280] sm:$0xff] }
  0x3a   :  { %2253 = vst [vmem:[#allocation36_spill] sm:$0xff] %v1378_v23  ;;  %v476_v39 = vmul.f32 %v1380_v19, %v1378_v23  ;;  %v202_v31 = vadd.f32 %v201_v21, %v155_v43  ;;  %v1423_v19 = vld [vmem:[#allocation5 + $0x388] sm:$0xff]  ;;  %v755_v21 = vmul.f32 %v1403_v63, %v285_v57  ;;  %v288_v57 = vld [vmem:[#allocation5 + $0x278] sm:$0xff] }
  0x3b   :  { %v796_v53 = vadd.f32 %v795_v35, %v749_v30  ;;  %v752_v30 = vmul.f32 %v1371_v49, %v282_v13  ;;  %v1393_v35 = vld [vmem:[#allocation2 + $0x78] sm:$0xff]  ;;  %v753_v13 = vmul.f32 %v1384_v38, %v283_v37  ;;  %v1408_v49 = vld [vmem:[#allocation5 + $0x380] sm:$0xff]  ;;  %v522_v54 = vadd.f32 %v521_v17, %v475_v46  ;;  %v1421_v38 = vld [vmem:[#allocation2 + $0x88] sm:$0xff]  ;;  %2267 = vst [vmem:[#allocation50_spill] sm:$0xff] %v1436_v14 }
  0x3c   :  { %2258 = vst [vmem:[#allocation41_spill] sm:$0xff] %v1393_v35  ;;  %v477_v47 = vmul.f32 %v1395_v42, %v1393_v35  ;;  %v834_v37 = vmul.f32 %v1199_v4, %v1245_v59  ;;  %v203_v43 = vadd.f32 %v202_v31, %v156_v2  ;;  %v287_v46 = vld [vmem:[#allocation5 + $0x270] sm:$0xff]  ;;  %v836_v2 = vmul.f32 %v1203_v6, %v1249_v61  ;;  %v1468_v6 = vld [vmem:[#allocation2 + $0xa0] sm:$0xff] }
  0x3d   :  { %v797_v56 = vadd.f32 %v796_v53, %v750_v58  ;;  %v1406_v53 = vld [vmem:[#allocation2 + $0x80] sm:$0xff]  ;;  %2264 = vst [vmem:[#allocation47_spill] sm:$0xff] %v1421_v38  ;;  %v523_v17 = vadd.f32 %v522_v54, %v476_v39  ;;  %v1438_v4 = vld [vmem:[#allocation5 + $0x390] sm:$0xff]  ;;  %v479_v39 = vmul.f32 %v1423_v19, %v1421_v38  ;;  %v160_v61 = vmul.f32 %v1432_v25, %v1365_v15  ;;  %v1483_v25 = vld [vmem:[#allocation5 + $0x3a8] sm:$0xff] }
  0x3e   :  { %2261 = vst [vmem:[#allocation44_spill] sm:$0xff] %v1406_v53  ;;  %v478_v59 = vmul.f32 %v1408_v49, %v1406_v53  ;;  %v204_v60 = vadd.f32 %v203_v43, %v157_v27  ;;  %v1455_v27 = vld [vmem:[#allocation5 + $0x398] sm:$0xff]  ;;  %v882_v43 = vadd.f32 %v835_v52, %v834_v37  ;;  %v1470_v15 = vld [vmem:[#allocation5 + $0x3a0] sm:$0xff]  ;;  %v161_v37 = vmul.f32 %v1447_v8, %v1378_v23  ;;  %v1496_v23 = vld [vmem:[#allocation5 + $0x3b0] sm:$0xff] }
  0x3f   :  { %v798_v58 = vadd.f32 %v797_v56, %v751_v51  ;;  %v1419_v51 = vld [vmem:[#allocation2 + $0x268] sm:$0xff]  ;;  %v524_v54 = vadd.f32 %v523_v17, %v477_v47  ;;  %2268 = vst [vmem:[#allocation51_spill] sm:$0xff] %v1447_v8  ;;  %v480_v17 = vmul.f32 %v1438_v4, %v1436_v14 }
  0x40   :  { %2263 = vst [vmem:[#allocation46_spill] sm:$0xff] %v1419_v51  ;;  %v756_v31 = vmul.f32 %v1419_v51, %v286_v10  ;;  %v205_v10 = vadd.f32 %v204_v60, %v158_v50  ;;  %v883_v52 = vadd.f32 %v882_v43, %v836_v2  ;;  %v1489_v43 = vld [vmem:[#allocation2 + $0x288] sm:$0xff] }
  0x41   :  { %v799_v56 = vadd.f32 %v798_v58, %v752_v30  ;;  %v1434_v30 = vld [vmem:[#allocation2 + $0x270] sm:$0xff]  ;;  %2270 = vst [vmem:[#allocation53_spill] sm:$0xff] %v1453_v41  ;;  %v525_v51 = vadd.f32 %v524_v54, %v478_v59  ;;  %v481_v59 = vmul.f32 %v1455_v27, %v1453_v41  ;;  %v1477_v54 = vld [vmem:[#allocation5 + $0x80] sm:$0xff]  ;;  %v1498_v8 = vld [vmem:[#allocation5 + $0x88] sm:$0xff] }
  0x42   :  { %2266 = vst [vmem:[#allocation49_spill] sm:$0xff] %v1434_v30  ;;  %v757_v47 = vmul.f32 %v1434_v30, %v287_v46  ;;  %v206_v50 = vadd.f32 %v205_v10, %v159_v62  ;;  %v1590_v30 = vld [vmem:[#allocation5 + $0x3e0] sm:$0xff] }
  0x43   :  { %v800_v58 = vadd.f32 %v799_v56, %v753_v13  ;;  %v837_v13 = vmul.f32 %v1205_v7, %v1253_v0  ;;  %v1451_v56 = vld [vmem:[#allocation2 + $0x278] sm:$0xff]  ;;  %2273 = vst [vmem:[#allocation56_spill] sm:$0xff] %v1468_v6  ;;  %v526_v60 = vadd.f32 %v525_v51, %v479_v39  ;;  %v482_v39 = vmul.f32 %v1470_v15, %v1468_v6 }
  0x44   :  { %2269 = vst [vmem:[#allocation52_spill] sm:$0xff] %v1451_v56  ;;  %v1462_v0 = vld [vmem:[#allocation5 + $0x78] sm:$0xff]  ;;  %v758_v46 = vmul.f32 %v1451_v56, %v288_v57  ;;  %v207_v2 = vadd.f32 %v206_v50, %v160_v61  ;;  %v1487_v57 = vld [vmem:[#allocation5 + $0x288] sm:$0xff] }
  0x45   :  { %v801_v63 = vadd.f32 %v800_v58, %v754_v18  ;;  %2271 = vst [vmem:[#allocation54_spill] sm:$0xff] %v1462_v0  ;;  %v838_v18 = vmul.f32 %v1210_v12, %v1259_v11  ;;  %v1466_v58 = vld [vmem:[#allocation2 + $0x280] sm:$0xff]  ;;  %v162_v62 = vmul.f32 %v1462_v0, %v1393_v35  ;;  %v884_v10 = vadd.f32 %v883_v52, %v837_v13  ;;  %v1502_v52 = vld [vmem:[#allocation5 + $0x290] sm:$0xff]  ;;  %v1512_v0 = vld [vmem:[#allocation2 + $0xb8] sm:$0xff] }
  0x46   :  { %2272 = vst [vmem:[#allocation55_spill] sm:$0xff] %v1466_v58  ;;  %v759_v51 = vmul.f32 %v1466_v58, %v289_v55  ;;  %v163_v13 = vmul.f32 %v1477_v54, %v1406_v53  ;;  %v208_v61 = vadd.f32 %v207_v2, %v161_v37  ;;  %v1504_v35 = vld [vmem:[#allocation2 + $0x290] sm:$0xff]  ;;  %v1514_v53 = vld [vmem:[#allocation5 + $0x3b8] sm:$0xff] }
  0x47   :  { %v802_v7 = vadd.f32 %v801_v63, %v755_v21  ;;  %2274 = vst [vmem:[#allocation57_spill] sm:$0xff] %v1477_v54  ;;  %v839_v63 = vmul.f32 %v1213_v16, %v1268_v22  ;;  %v1481_v21 = vld [vmem:[#allocation2 + $0xa8] sm:$0xff]  ;;  %v527_v22 = vadd.f32 %v526_v60, %v480_v17  ;;  %v885_v50 = vadd.f32 %v884_v10, %v838_v18  ;;  %v1516_v2 = vld [vmem:[#allocation5 + $0x298] sm:$0xff]  ;;  %v1518_v10 = vld [vmem:[#allocation5 + $0x2a0] sm:$0xff] }
  0x48   :  { %2275 = vst [vmem:[#allocation58_spill] sm:$0xff] %v1481_v21  ;;  %v483_v55 = vmul.f32 %v1483_v25, %v1481_v21  ;;  %v760_v60 = vmul.f32 %v1489_v43, %v1487_v57  ;;  %v209_v18 = vadd.f32 %v208_v61, %v162_v62  ;;  %v1520_v54 = vld [vmem:[#allocation2 + $0x298] sm:$0xff]  ;;  %v1532_v62 = vld [vmem:[#allocation5 + $0x90] sm:$0xff] }
  0x49   :  { %v803_v11 = vadd.f32 %v802_v7, %v756_v31  ;;  %2276 = vst [vmem:[#allocation59_spill] sm:$0xff] %v1487_v57  ;;  %v1494_v31 = vld [vmem:[#allocation2 + $0xb0] sm:$0xff]  ;;  %v528_v17 = vadd.f32 %v527_v22, %v481_v59  ;;  %v886_v37 = vadd.f32 %v885_v50, %v839_v63  ;;  %v1530_v63 = vld [vmem:[#allocation5 + $0x3c0] sm:$0xff]  ;;  %v1536_v57 = vld [vmem:[#allocation2 + $0xc8] sm:$0xff] }
  0x4a   :  { %2277 = vst [vmem:[#allocation60_spill] sm:$0xff] %v1489_v43  ;;  %v484_v59 = vmul.f32 %v1496_v23, %v1494_v31  ;;  %v210_v61 = vadd.f32 %v209_v18, %v163_v13  ;;  %v1534_v50 = vld [vmem:[#allocation2 + $0x2a0] sm:$0xff]  ;;  %v1538_v43 = vld [vmem:[#allocation5 + $0x3c8] sm:$0xff]  ;;  %v1548_v18 = vld [vmem:[#allocation5 + $0x98] sm:$0xff] }
  0x4b   :  { %v804_v7 = vadd.f32 %v803_v11, %v757_v47  ;;  %2278 = vst [vmem:[#allocation61_spill] sm:$0xff] %v1494_v31  ;;  %v840_v47 = vmul.f32 %v1216_v20, %v1276_v33  ;;  %v529_v20 = vadd.f32 %v528_v17, %v482_v39  ;;  %v164_v33 = vmul.f32 %v1498_v8, %v1421_v38  ;;  %v1554_v58 = vld [vmem:[#allocation5 + $0x3d0] sm:$0xff]  ;;  %v1570_v56 = vld [vmem:[#allocation2 + $0xd8] sm:$0xff] }
  0x4c   :  { %2279 = vst [vmem:[#allocation62_spill] sm:$0xff] %v1498_v8  ;;  %v485_v39 = vmul.f32 %v1514_v53, %v1512_v0  ;;  %v762_v38 = vmul.f32 %v1520_v54, %v1516_v2  ;;  %v1550_v8 = vld [vmem:[#allocation2 + $0x2a8] sm:$0xff] }
  0x4d   :  { %2280 = vst [vmem:[#allocation63_spill] sm:$0xff] %v1502_v52  ;;  %v805_v11 = vadd.f32 %v804_v7, %v758_v46  ;;  %v761_v46 = vmul.f32 %v1504_v35, %v1502_v52  ;;  %v1528_v7 = vld [vmem:[#allocation2 + $0xc0] sm:$0xff]  ;;  %v530_v17 = vadd.f32 %v529_v20, %v483_v55  ;;  %v1544_v52 = vld [vmem:[#allocation5 + $0x2a8] sm:$0xff] }
  0x4e   :  { %2281 = vst [vmem:[#allocation64_spill] sm:$0xff] %v1504_v35  ;;  %v1552_v35 = vld [vmem:[#allocation2 + $0xd0] sm:$0xff]  ;;  %v486_v55 = vmul.f32 %v1530_v63, %v1528_v7 }
  0x4f   :  { %2282 = vst [vmem:[#allocation65_spill] sm:$0xff] %v1512_v0  ;;  %v806_v22 = vadd.f32 %v805_v11, %v759_v51  ;;  %v841_v51 = vmul.f32 %v1219_v24, %v1285_v45  ;;  %v887_v11 = vadd.f32 %v886_v37, %v840_v47  ;;  %v531_v20 = vadd.f32 %v530_v17, %v484_v59  ;;  %v1560_v47 = vld [vmem:[#allocation5 + $0x2b0] sm:$0xff]  ;;  %v1572_v59 = vld [vmem:[#allocation5 + $0x3d8] sm:$0xff] }
  0x50   :  { %2283 = vst [vmem:[#allocation66_spill] sm:$0xff] %v1516_v2  ;;  %v165_v24 = vmul.f32 %v1532_v62, %v1436_v14  ;;  %v211_v45 = vadd.f32 %v210_v61, %v164_v33  ;;  %v1562_v37 = vld [vmem:[#allocation2 + $0x2b0] sm:$0xff]  ;;  %v487_v2 = vmul.f32 %v1538_v43, %v1536_v57  ;;  %v1574_v14 = vld [vmem:[#allocation5 + $0xa8] sm:$0xff]  ;;  %v166_v33 = vmul.f32 %v1548_v18, %v1453_v41 }
  0x51   :  { %2284 = vst [vmem:[#allocation67_spill] sm:$0xff] %v1518_v10  ;;  %v807_v13 = vadd.f32 %v806_v22, %v760_v60  ;;  %v763_v60 = vmul.f32 %v1534_v50, %v1518_v10  ;;  %v532_v17 = vadd.f32 %v531_v20, %v485_v39  ;;  %v842_v61 = vmul.f32 %v1222_v28, %v1301_v3  ;;  %v1588_v20 = vld [vmem:[#allocation2 + $0xe0] sm:$0xff] }
  0x52   :  { %2285 = vst [vmem:[#allocation68_spill] sm:$0xff] %v1520_v54  ;;  %v1568_v54 = vld [vmem:[#allocation5 + $0xa0] sm:$0xff]  ;;  %v888_v10 = vadd.f32 %v887_v11, %v841_v51  ;;  %v488_v39 = vmul.f32 %v1554_v58, %v1552_v35  ;;  %v212_v3 = vadd.f32 %v211_v45, %v165_v24  ;;  %v843_v51 = vmul.f32 %v1225_v32, %v1316_v29  ;;  %v1610_v24 = vld [vmem:[#allocation5 + $0x3e8] sm:$0xff]  ;;  %v1612_v32 = vld [vmem:[#allocation5 + $0xb8] sm:$0xff] }
  0x53   :  { %2286 = vst [vmem:[#allocation69_spill] sm:$0xff] %v1528_v7  ;;  %v808_v22 = vadd.f32 %v807_v13, %v761_v46  ;;  %v1580_v46 = vld [vmem:[#allocation5 + $0x2b8] sm:$0xff]  ;;  %v533_v41 = vadd.f32 %v532_v17, %v486_v55  ;;  %v167_v28 = vmul.f32 %v1568_v54, %v1468_v6  ;;  %v1598_v11 = vld [vmem:[#allocation5 + $0x2c0] sm:$0xff]  ;;  %v489_v55 = vmul.f32 %v1572_v59, %v1570_v56 }
  0x54   :  { %2287 = vst [vmem:[#allocation70_spill] sm:$0xff] %v1532_v62  ;;  %v1582_v13 = vld [vmem:[#allocation2 + $0x2b8] sm:$0xff]  ;;  %v764_v62 = vmul.f32 %v1550_v8, %v1544_v52  ;;  %v168_v17 = vmul.f32 %v1574_v14, %v1481_v21  ;;  %v213_v29 = vadd.f32 %v212_v3, %v166_v33  ;;  %v844_v6 = vmul.f32 %v1228_v36, %v1329_v1  ;;  %v1626_v33 = vld [vmem:[#allocation5 + $0xc0] sm:$0xff] }
  0x55   :  { %2288 = vst [vmem:[#allocation71_spill] sm:$0xff] %v1534_v50  ;;  %v809_v50 = vadd.f32 %v808_v22, %v762_v38  ;;  %v1600_v38 = vld [vmem:[#allocation2 + $0x2c0] sm:$0xff]  ;;  %v765_v22 = vmul.f32 %v1562_v37, %v1560_v47  ;;  %v534_v45 = vadd.f32 %v533_v41, %v487_v2  ;;  %v1624_v41 = vld [vmem:[#allocation2 + $0x2c8] sm:$0xff]  ;;  %v845_v36 = vmul.f32 %v1231_v40, %v1341_v26 }
  0x56   :  { %2289 = vst [vmem:[#allocation72_spill] sm:$0xff] %v1536_v57  ;;  %v214_v3 = vadd.f32 %v213_v29, %v167_v28  ;;  %v1642_v28 = vld [vmem:[#allocation2 + $0x2d0] sm:$0xff]  ;;  %v1644_v26 = vld [vmem:[#allocation5 + $0xc8] sm:$0xff] }
  0x57   :  { %2290 = vst [vmem:[#allocation73_spill] sm:$0xff] %v1544_v52  ;;  %v810_v52 = vadd.f32 %v809_v50, %v763_v60  ;;  %v766_v50 = vmul.f32 %v1582_v13, %v1580_v46  ;;  %v535_v2 = vadd.f32 %v534_v45, %v488_v39  ;;  %v170_v39 = vmul.f32 %v1612_v32, %v1512_v0  ;;  %v1640_v45 = vld [vmem:[#allocation5 + $0x2d0] sm:$0xff] }
  0x58   :  { %2291 = vst [vmem:[#allocation74_spill] sm:$0xff] %v1548_v18  ;;  %v1592_v18 = vld [vmem:[#allocation5 + $0xb0] sm:$0xff]  ;;  %v171_v0 = vmul.f32 %v1626_v33, %v1528_v7  ;;  %v1670_v7 = vld [vmem:[#allocation5 + $0x400] sm:$0xff] }
  0x59   :  { %2292 = vst [vmem:[#allocation75_spill] sm:$0xff] %v1550_v8  ;;  %v1608_v8 = vld [vmem:[#allocation2 + $0xe8] sm:$0xff]  ;;  %v811_v60 = vadd.f32 %v810_v52, %v764_v62  ;;  %v169_v21 = vmul.f32 %v1592_v18, %v1494_v31  ;;  %v767_v52 = vmul.f32 %v1600_v38, %v1598_v11  ;;  %v1632_v62 = vld [vmem:[#allocation2 + $0xf0] sm:$0xff]  ;;  %v536_v40 = vadd.f32 %v535_v2, %v489_v55  ;;  %v1652_v31 = vld [vmem:[#allocation5 + $0x3f8] sm:$0xff] }
  0x5a   :  { %2293 = vst [vmem:[#allocation76_spill] sm:$0xff] %v1552_v35  ;;  %v847_v55 = vmul.f32 %v1237_v48, %v1367_v9  ;;  %v1658_v2 = vld [vmem:[#allocation5 + $0x2d8] sm:$0xff]  ;;  %v172_v48 = vmul.f32 %v1644_v26, %v1536_v57  ;;  %v1688_v57 = vld [vmem:[#allocation5 + $0x408] sm:$0xff] }
  0x5b   :  { %2294 = vst [vmem:[#allocation77_spill] sm:$0xff] %v1560_v47  ;;  %v490_v47 = vmul.f32 %v1590_v30, %v1588_v20  ;;  %v2315_v9 = vld [vmem:[#allocation37_spill] sm:$0xff] }
  0x5c   :  { %2295 = vst [vmem:[#allocation78_spill] sm:$0xff] %v1568_v54  ;;  %v889_v54 = vadd.f32 %v888_v10, %v842_v61  ;;  %v812_v10 = vadd.f32 %v811_v60, %v765_v22  ;;  %v1634_v61 = vld [vmem:[#allocation5 + $0x3f0] sm:$0xff] }
  0x5d   :  { %2296 = vst [vmem:[#allocation79_spill] sm:$0xff] %v1570_v56 }
  0x5e   :  { %2297 = vst [vmem:[#allocation80_spill] sm:$0xff] %v1574_v14  ;;  %v1622_v14 = vld [vmem:[#allocation5 + $0x2c8] sm:$0xff]  ;;  %v890_v1 = vadd.f32 %v889_v54, %v843_v51  ;;  %v215_v54 = vadd.f32 %v214_v3, %v168_v17  ;;  %v846_v51 = vmul.f32 %v1234_v44, %v1354_v34  ;;  %v813_v60 = vadd.f32 %v812_v10, %v766_v50  ;;  %v1660_v17 = vld [vmem:[#allocation2 + $0x2d8] sm:$0xff]  ;;  %v1664_v34 = vld [vmem:[#allocation5 + $0xd0] sm:$0xff] }
  0x5f   :  { %2298 = vst [vmem:[#allocation81_spill] sm:$0xff] %v1580_v46  ;;  %v491_v46 = vmul.f32 %v1610_v24, %v1608_v8  ;;  %v768_v29 = vmul.f32 %v1624_v41, %v1622_v14  ;;  %v537_v44 = vadd.f32 %v536_v40, %v490_v47  ;;  %v1678_v47 = vld [vmem:[#allocation2 + $0x2e0] sm:$0xff]  ;;  %v1682_v40 = vld [vmem:[#allocation5 + $0xd8] sm:$0xff] }
  0x60   :  { %2299 = vst [vmem:[#allocation82_spill] sm:$0xff] %v1588_v20  ;;  %v891_v22 = vadd.f32 %v890_v1, %v844_v6  ;;  %v492_v6 = vmul.f32 %v1634_v61, %v1632_v62  ;;  %v216_v50 = vadd.f32 %v215_v54, %v169_v21  ;;  %v769_v1 = vmul.f32 %v1642_v28, %v1640_v45 }
  0x61   :  { %2300 = vst [vmem:[#allocation83_spill] sm:$0xff] %v1592_v18  ;;  %v814_v10 = vadd.f32 %v813_v60, %v767_v52  ;;  %v1676_v18 = vld [vmem:[#allocation5 + $0x2e0] sm:$0xff] }
  0x62   :  { %2301 = vst [vmem:[#allocation84_spill] sm:$0xff] %v1598_v11  ;;  %v1650_v11 = vld [vmem:[#allocation2 + $0xf8] sm:$0xff]  ;;  %v892_v3 = vadd.f32 %v891_v22, %v845_v36  ;;  %v538_v36 = vadd.f32 %v537_v44, %v491_v46  ;;  %v217_v52 = vadd.f32 %v216_v50, %v170_v39  ;;  %v770_v22 = vmul.f32 %v1660_v17, %v1658_v2  ;;  %v1696_v46 = vld [vmem:[#allocation2 + $0x2e8] sm:$0xff]  ;;  %v1700_v44 = vld [vmem:[#allocation5 + $0xe0] sm:$0xff] }
  0x63   :  { %2302 = vst [vmem:[#allocation85_spill] sm:$0xff] %v1608_v8  ;;  %v493_v21 = vmul.f32 %v1652_v31, %v1650_v11  ;;  %v815_v60 = vadd.f32 %v814_v10, %v768_v29 }
  0x64   :  { %2303 = vst [vmem:[#allocation86_spill] sm:$0xff] %v1612_v32  ;;  %v893_v54 = vadd.f32 %v892_v3, %v846_v51  ;;  %v539_v51 = vadd.f32 %v538_v36, %v492_v6  ;;  %v218_v29 = vadd.f32 %v217_v52, %v171_v0  ;;  %v771_v3 = vmul.f32 %v1678_v47, %v1676_v18  ;;  %v1714_v6 = vld [vmem:[#allocation2 + $0x2f0] sm:$0xff]  ;;  %v1718_v36 = vld [vmem:[#allocation5 + $0xe8] sm:$0xff] }
  0x65   :  { %2304 = vst [vmem:[#allocation87_spill] sm:$0xff] %v1622_v14  ;;  %v1668_v14 = vld [vmem:[#allocation2 + $0x100] sm:$0xff]  ;;  %v816_v10 = vadd.f32 %v815_v60, %v769_v1 }
  0x66   :  { %2305 = vst [vmem:[#allocation88_spill] sm:$0xff] %v1626_v33  ;;  %v2316_v33 = vld [vmem:[#allocation14_spill] sm:$0xff]  ;;  %v494_v39 = vmul.f32 %v1670_v7, %v1668_v14  ;;  %v894_v50 = vadd.f32 %v893_v54, %v847_v55  ;;  %v540_v55 = vadd.f32 %v539_v51, %v493_v21  ;;  %v219_v1 = vadd.f32 %v218_v29, %v172_v48  ;;  %v1736_v51 = vld [vmem:[#allocation5 + $0xf0] sm:$0xff] }
  0x67   :  { %2306 = vst [vmem:[#allocation89_spill] sm:$0xff] %v1632_v62  ;;  %v848_v32 = vmul.f32 %v2316_v33, %v2315_v9  ;;  %v173_v33 = vmul.f32 %v1664_v34, %v1552_v35  ;;  %v2321_v9 = vld [vmem:[#allocation15_spill] sm:$0xff]  ;;  %v1706_v35 = vld [vmem:[#allocation5 + $0x410] sm:$0xff]  ;;  %v817_v60 = vadd.f32 %v816_v10, %v770_v22  ;;  %v1732_v21 = vld [vmem:[#allocation2 + $0x2f8] sm:$0xff] }
  0x68   :  { %2307 = vst [vmem:[#allocation90_spill] sm:$0xff] %v1640_v45  ;;  %v1686_v45 = vld [vmem:[#allocation2 + $0x108] sm:$0xff]  ;;  %v541_v48 = vadd.f32 %v540_v55, %v494_v39 }
  0x69   :  { %2308 = vst [vmem:[#allocation91_spill] sm:$0xff] %v1642_v28  ;;  %v1694_v28 = vld [vmem:[#allocation5 + $0x2e8] sm:$0xff]  ;;  %v495_v0 = vmul.f32 %v1688_v57, %v1686_v45  ;;  %v895_v52 = vadd.f32 %v894_v50, %v848_v32  ;;  %v220_v22 = vadd.f32 %v219_v1, %v173_v33  ;;  %v818_v10 = vadd.f32 %v817_v60, %v771_v3  ;;  %v1750_v33 = vld [vmem:[#allocation5 + $0xf8] sm:$0xff] }
  0x6a   :  { %2309 = vst [vmem:[#allocation92_spill] sm:$0xff] %v1644_v26  ;;  %v849_v26 = vmul.f32 %v2321_v9, %v1395_v42  ;;  %v174_v42 = vmul.f32 %v1682_v40, %v1570_v56  ;;  %v2326_v9 = vld [vmem:[#allocation16_spill] sm:$0xff]  ;;  %v772_v54 = vmul.f32 %v1696_v46, %v1694_v28  ;;  %v1724_v56 = vld [vmem:[#allocation5 + $0x418] sm:$0xff] }
  0x6b   :  { %2310 = vst [vmem:[#allocation93_spill] sm:$0xff] %v1650_v11  ;;  %v542_v55 = vadd.f32 %v541_v48, %v495_v0  ;;  %v1754_v60 = vld [vmem:[#allocation2 + $0x128] sm:$0xff] }
  0x6c   :  { %2311 = vst [vmem:[#allocation94_spill] sm:$0xff] %v1658_v2  ;;  %v1704_v2 = vld [vmem:[#allocation2 + $0x110] sm:$0xff]  ;;  %v896_v29 = vadd.f32 %v895_v52, %v849_v26  ;;  %v221_v26 = vadd.f32 %v220_v22, %v174_v42  ;;  %v819_v52 = vadd.f32 %v818_v10, %v772_v54  ;;  %v1764_v42 = vld [vmem:[#allocation5 + $0x100] sm:$0xff] }
  0x6d   :  { %2312 = vst [vmem:[#allocation95_spill] sm:$0xff] %v1660_v17  ;;  %v1712_v17 = vld [vmem:[#allocation5 + $0x2f0] sm:$0xff]  ;;  %v496_v32 = vmul.f32 %v1706_v35, %v1704_v2 }
  0x6e   :  { %2313 = vst [vmem:[#allocation96_spill] sm:$0xff] %v1664_v34  ;;  %v850_v34 = vmul.f32 %v2326_v9, %v1408_v49  ;;  %v175_v49 = vmul.f32 %v1700_v44, %v1588_v20  ;;  %v2331_v9 = vld [vmem:[#allocation17_spill] sm:$0xff]  ;;  %v773_v50 = vmul.f32 %v1714_v6, %v1712_v17  ;;  %v1742_v20 = vld [vmem:[#allocation5 + $0x420] sm:$0xff] }
  0x6f   :  { %2314 = vst [vmem:[#allocation97_spill] sm:$0xff] %v1668_v14  ;;  %v543_v48 = vadd.f32 %v542_v55, %v496_v32  ;;  %v1766_v54 = vld [vmem:[#allocation2 + $0x130] sm:$0xff] }
  0x70   :  { %2317 = vst [vmem:[#allocation37_spill] sm:$0xff] %v1676_v18  ;;  %v1722_v18 = vld [vmem:[#allocation2 + $0x118] sm:$0xff]  ;;  %v897_v1 = vadd.f32 %v896_v29, %v850_v34  ;;  %v222_v34 = vadd.f32 %v221_v26, %v175_v49  ;;  %v820_v29 = vadd.f32 %v819_v52, %v773_v50  ;;  %v1768_v10 = vld [vmem:[#allocation5 + $0x430] sm:$0xff]  ;;  %v1778_v49 = vld [vmem:[#allocation5 + $0x108] sm:$0xff] }
  0x71   :  { %2318 = vst [vmem:[#allocation14_spill] sm:$0xff] %v1678_v47  ;;  %v1730_v47 = vld [vmem:[#allocation5 + $0x2f8] sm:$0xff]  ;;  %v497_v39 = vmul.f32 %v1724_v56, %v1722_v18 }
  0x72   :  { %2319 = vst [vmem:[#allocation98_spill] sm:$0xff] %v1682_v40  ;;  %v851_v40 = vmul.f32 %v2331_v9, %v1423_v19  ;;  %v176_v19 = vmul.f32 %v1718_v36, %v1608_v8  ;;  %v2336_v9 = vld [vmem:[#allocation18_spill] sm:$0xff]  ;;  %v774_v3 = vmul.f32 %v1732_v21, %v1730_v47  ;;  %v177_v8 = vmul.f32 %v1736_v51, %v1632_v62  ;;  %v2342_v62 = vld [vmem:[#allocation24_spill] sm:$0xff] }
  0x73   :  { %2320 = vst [vmem:[#allocation99_spill] sm:$0xff] %v1686_v45  ;;  %v544_v55 = vadd.f32 %v543_v48, %v497_v39  ;;  %v1782_v52 = vld [vmem:[#allocation5 + $0x438] sm:$0xff]  ;;  %v500_v39 = vmul.f32 %v1768_v10, %v1766_v54 }
  0x74   :  { %2322 = vst [vmem:[#allocation15_spill] sm:$0xff] %v1694_v28  ;;  %v1740_v28 = vld [vmem:[#allocation2 + $0x120] sm:$0xff]  ;;  %v898_v22 = vadd.f32 %v897_v1, %v851_v40  ;;  %v223_v40 = vadd.f32 %v222_v34, %v176_v19  ;;  %v821_v26 = vadd.f32 %v820_v29, %v774_v3  ;;  %v1780_v1 = vld [vmem:[#allocation2 + $0x138] sm:$0xff]  ;;  %v180_v29 = vmul.f32 %v1778_v49, %v1686_v45 }
  0x75   :  { %2323 = vst [vmem:[#allocation100_spill] sm:$0xff] %v1696_v46  ;;  %v498_v0 = vmul.f32 %v1742_v20, %v1740_v28  ;;  %v1792_v3 = vld [vmem:[#allocation2 + $0x140] sm:$0xff]  ;;  %v1812_v45 = vld [vmem:[#allocation5 + $0x118] sm:$0xff] }
  0x76   :  { %2324 = vst [vmem:[#allocation101_spill] sm:$0xff] %v1700_v44  ;;  %v852_v44 = vmul.f32 %v2336_v9, %v1438_v4  ;;  %v2339_v4 = vld [vmem:[#allocation20_spill] sm:$0xff]  ;;  %v224_v19 = vadd.f32 %v223_v40, %v177_v8  ;;  %822 = vadd.xlane.f32.xlu2 %v821_v26  ;;  %v1794_v34 = vld [vmem:[#allocation5 + $0x440] sm:$0xff] }
  0x77   :  { %2325 = vst [vmem:[#allocation102_spill] sm:$0xff] %v1704_v2  ;;  %v853_v9 = vmul.f32 %v2339_v4, %v1455_v27  ;;  %v2343_v27 = vld [vmem:[#allocation26_spill] sm:$0xff]  ;;  %v545_v48 = vadd.f32 %v544_v55, %v498_v0  ;;  %v2354_v0 = vld [vmem:[#allocation12_spill] sm:$0xff] }
  0x78   :  { %2327 = vst [vmem:[#allocation16_spill] sm:$0xff] %v1712_v17  ;;  %v1756_v17 = vld [vmem:[#allocation5 + $0x428] sm:$0xff]  ;;  %v855_v4 = vmul.f32 %v2343_v27, %v1483_v25  ;;  %v899_v50 = vadd.f32 %v898_v22, %v852_v44  ;;  %v2348_v25 = vld [vmem:[#allocation21_spill] sm:$0xff]  ;;  %v1022_v46 = vld [vmem:[#allocation2 + $0x1c0] sm:$0xff] }
  0x79   :  { %2328 = vst [vmem:[#allocation103_spill] sm:$0xff] %v1714_v6  ;;  %v499_v32 = vmul.f32 %v1756_v17, %v1754_v60  ;;  %v620_v27 = vmul.f32 %v1201_v5, %v2348_v25  ;;  %v1796_v22 = vld [vmem:[#allocation5 + $0x110] sm:$0xff]  ;;  %v2352_v5 = vld [vmem:[#allocation30_spill] sm:$0xff]  ;;  %v1808_v26 = vld [vmem:[#allocation2 + $0x148] sm:$0xff] }
  0x7a   :  { %2329 = vst [vmem:[#allocation104_spill] sm:$0xff] %v1718_v36  ;;  %v900_v44 = vadd.f32 %v899_v50, %v853_v9  ;;  %v857_v25 = vmul.f32 %v2352_v5, %v1514_v53  ;;  %v501_v9 = vmul.f32 %v1782_v52, %v1780_v1  ;;  %v2358_v53 = vld [vmem:[#allocation34_spill] sm:$0xff] }
  0x7b   :  { %2330 = vst [vmem:[#allocation105_spill] sm:$0xff] %v1722_v18  ;;  %v546_v55 = vadd.f32 %v545_v48, %v499_v32  ;;  %v859_v5 = vmul.f32 %v2358_v53, %v1538_v43  ;;  %v181_v32 = vmul.f32 %v1796_v22, %v1704_v2  ;;  %v2362_v43 = vld [vmem:[#allocation38_spill] sm:$0xff] }
  0x7c   :  { %2332 = vst [vmem:[#allocation17_spill] sm:$0xff] %v1730_v47  ;;  %v178_v47 = vmul.f32 %v1750_v33, %v1650_v11  ;;  %v179_v11 = vmul.f32 %v1764_v42, %v1668_v14  ;;  %v2353_v14 = vld [vmem:[#allocation22_spill] sm:$0xff] }
  0x7d   :  { %2333 = vst [vmem:[#allocation106_spill] sm:$0xff] %v1732_v21  ;;  %v621_v8 = vmul.f32 %v2354_v0, %v2353_v14  ;;  %v2360_v14 = vld [vmem:[#allocation13_spill] sm:$0xff] }
  0x7e   :  { %2334 = vst [vmem:[#allocation107_spill] sm:$0xff] %v1736_v51  ;;  %v854_v51 = vmul.f32 %v2342_v62, %v1470_v15  ;;  %v2346_v15 = vld [vmem:[#allocation19_spill] sm:$0xff]  ;;  %v225_v40 = vadd.f32 %v224_v19, %v178_v47  ;;  %v502_v47 = vmul.f32 %v1794_v34, %v1792_v3  ;;  %v1824_v19 = vld [vmem:[#allocation2 + $0x150] sm:$0xff]  ;;  %v1840_v2 = vld [vmem:[#allocation5 + $0x458] sm:$0xff] }
  0x7f   :  { %2335 = vst [vmem:[#allocation108_spill] sm:$0xff] %v1740_v28  ;;  %v2347_v62 = vld [vmem:[#allocation11_spill] sm:$0xff]  ;;  %v1865_v21 = vld [vmem:[#allocation2 + $0x170] sm:$0xff] }
  0x80   :  { %2337 = vst [vmem:[#allocation18_spill] sm:$0xff] %v1750_v33  ;;  %v619_v33 = vmul.f32 %v2347_v62, %v2346_v15  ;;  %v2351_v15 = vld [vmem:[#allocation28_spill] sm:$0xff]  ;;  %v901_v50 = vadd.f32 %v900_v44, %v854_v51  ;;  %v547_v51 = vadd.f32 %v546_v55, %v500_v39  ;;  %v226_v48 = vadd.f32 %v225_v40, %v179_v11 }
  0x81   :  { %2338 = vst [vmem:[#allocation109_spill] sm:$0xff] %v1754_v60  ;;  %v856_v62 = vmul.f32 %v2351_v15, %v1496_v23  ;;  %v2357_v23 = vld [vmem:[#allocation32_spill] sm:$0xff]  ;;  %v182_v11 = vmul.f32 %v1812_v45, %v1722_v18 }
  0x82   :  { %2340 = vst [vmem:[#allocation20_spill] sm:$0xff] %v1764_v42  ;;  %v1810_v42 = vld [vmem:[#allocation5 + $0x448] sm:$0xff]  ;;  %v858_v15 = vmul.f32 %v2357_v23, %v1530_v63  ;;  %v667_v36 = vadd.f32 %v620_v27, %v619_v33  ;;  %v1826_v44 = vld [vmem:[#allocation5 + $0x450] sm:$0xff]  ;;  %v1828_v63 = vld [vmem:[#allocation5 + $0x120] sm:$0xff]  ;;  %v860_v23 = vmul.f32 %v2362_v43, %v1554_v58  ;;  %v902_v53 = vadd.f32 %v901_v50, %v855_v4 }
  0x83   :  { %2341 = vst [vmem:[#allocation110_spill] sm:$0xff] %v1766_v54  ;;  %v503_v39 = vmul.f32 %v1810_v42, %v1808_v26  ;;  %v548_v55 = vadd.f32 %v547_v51, %v501_v9  ;;  %v227_v40 = vadd.f32 %v226_v48, %v180_v29  ;;  %v2366_v58 = vld [vmem:[#allocation40_spill] sm:$0xff]  ;;  %v1848_v43 = vld [vmem:[#allocation2 + $0x160] sm:$0xff]  ;;  %v504_v29 = vmul.f32 %v1826_v44, %v1824_v19 }
  0x84   :  { %2344 = vst [vmem:[#allocation24_spill] sm:$0xff] %v1778_v49  ;;  %v2359_v49 = vld [vmem:[#allocation23_spill] sm:$0xff]  ;;  %v668_v27 = vadd.f32 %v667_v36, %v621_v8  ;;  %v861_v4 = vmul.f32 %v2366_v58, %v1572_v59  ;;  %v903_v50 = vadd.f32 %v902_v53, %v856_v62  ;;  %v183_v48 = vmul.f32 %v1828_v63, %v1740_v28  ;;  %v1860_v62 = vld [vmem:[#allocation5 + $0x130] sm:$0xff] }
  0x85   :  { %2345 = vst [vmem:[#allocation26_spill] sm:$0xff] %v1780_v1  ;;  %v622_v0 = vmul.f32 %v2360_v14, %v2359_v49  ;;  %v2363_v49 = vld [vmem:[#allocation25_spill] sm:$0xff]  ;;  %v1850_v9 = vld [vmem:[#allocation5 + $0x460] sm:$0xff]  ;;  %v549_v51 = vadd.f32 %v548_v55, %v502_v47  ;;  %v1856_v18 = vld [vmem:[#allocation2 + $0x168] sm:$0xff] }
  0x86   :  { %2349 = vst [vmem:[#allocation19_spill] sm:$0xff] %v1792_v3  ;;  %v623_v33 = vmul.f32 %v1210_v12, %v2363_v49  ;;  %v1838_v14 = vld [vmem:[#allocation2 + $0x158] sm:$0xff]  ;;  %v2367_v12 = vld [vmem:[#allocation27_spill] sm:$0xff]  ;;  %v228_v49 = vadd.f32 %v227_v40, %v181_v32  ;;  %v904_v53 = vadd.f32 %v903_v50, %v857_v25  ;;  %v1867_v47 = vld [vmem:[#allocation5 + $0x470] sm:$0xff]  ;;  %v506_v25 = vmul.f32 %v1850_v9, %v1848_v43 }
  0x87   :  { %2350 = vst [vmem:[#allocation11_spill] sm:$0xff] %v1796_v22  ;;  %v1842_v22 = vld [vmem:[#allocation5 + $0x128] sm:$0xff]  ;;  %v624_v36 = vmul.f32 %v1213_v16, %v2367_v12  ;;  %v669_v8 = vadd.f32 %v668_v27, %v622_v0  ;;  %v1020_v27 = vld [vmem:[#allocation2 + $0x1b0] sm:$0xff]  ;;  %v505_v32 = vmul.f32 %v1840_v2, %v1838_v14  ;;  %v550_v55 = vadd.f32 %v549_v51, %v503_v39 }
  0x88   :  { %2355 = vst [vmem:[#allocation21_spill] sm:$0xff] %v1808_v26  ;;  %v1858_v59 = vld [vmem:[#allocation5 + $0x468] sm:$0xff]  ;;  %v2371_v58 = vld [vmem:[#allocation29_spill] sm:$0xff]  ;;  %v184_v40 = vmul.f32 %v1842_v22, %v1754_v60  ;;  %v229_v28 = vadd.f32 %v228_v49, %v182_v11  ;;  %v905_v50 = vadd.f32 %v904_v53, %v858_v15  ;;  %v185_v11 = vmul.f32 %v1860_v62, %v1766_v54 }
  0x89   :  { %2356 = vst [vmem:[#allocation28_spill] sm:$0xff] %v1812_v45  ;;  %v2370_v16 = vld [vmem:[#allocation43_spill] sm:$0xff]  ;;  %v625_v12 = vmul.f32 %v1020_v27, %v2371_v58  ;;  %v670_v45 = vadd.f32 %v669_v8, %v623_v33  ;;  %v1879_v33 = vld [vmem:[#allocation5 + $0x138] sm:$0xff]  ;;  %v507_v39 = vmul.f32 %v1858_v59, %v1856_v18  ;;  %v551_v51 = vadd.f32 %v550_v55, %v504_v29 }
  0x8a   :  { %2361 = vst [vmem:[#allocation30_spill] sm:$0xff] %v1828_v63  ;;  %v862_v0 = vmul.f32 %v2370_v16, %v1590_v30  ;;  %v1873_v63 = vld [vmem:[#allocation2 + $0x178] sm:$0xff]  ;;  %v2375_v16 = vld [vmem:[#allocation31_spill] sm:$0xff]  ;;  %v230_v49 = vadd.f32 %v229_v28, %v183_v48  ;;  %v508_v60 = vmul.f32 %v1867_v47, %v1865_v21  ;;  %v906_v6 = vadd.f32 %v905_v50, %v859_v5 }
  0x8b   :  { %2364 = vst [vmem:[#allocation22_spill] sm:$0xff] %v1838_v14  ;;  %v1875_v30 = vld [vmem:[#allocation5 + $0x478] sm:$0xff]  ;;  %v671_v58 = vadd.f32 %v670_v45, %v624_v36  ;;  %v552_v36 = vadd.f32 %v551_v51, %v505_v32  ;;  %v186_v29 = vmul.f32 %v1879_v33, %v1780_v1  ;;  %v1023_v54 = vld [vmem:[#allocation2 + $0x1c8] sm:$0xff] }
  0x8c   :  { %2365 = vst [vmem:[#allocation12_spill] sm:$0xff] %v1842_v22  ;;  %v1021_v8 = vld [vmem:[#allocation2 + $0x1b8] sm:$0xff]  ;;  %v1888_v22 = vld [vmem:[#allocation5 + $0x140] sm:$0xff]  ;;  %v509_v45 = vmul.f32 %v1875_v30, %v1873_v63  ;;  %v231_v28 = vadd.f32 %v230_v49, %v184_v40 }
  0x8d   :  { %2368 = vst [vmem:[#allocation32_spill] sm:$0xff] %v1850_v9  ;;  %v626_v27 = vmul.f32 %v1021_v8, %v2375_v16  ;;  %v2377_v15 = vld [vmem:[#allocation33_spill] sm:$0xff]  ;;  %v672_v9 = vadd.f32 %v671_v58, %v625_v12  ;;  %v1893_v8 = vld [vmem:[#allocation5 + $0x148] sm:$0xff]  ;;  %v2379_v48 = vld [vmem:[#allocation46_spill] sm:$0xff]  ;;  %v907_v16 = vadd.f32 %v906_v6, %v860_v23  ;;  %v187_v12 = vmul.f32 %v1888_v22, %v1792_v3 }
  0x8e   :  { %2369 = vst [vmem:[#allocation34_spill] sm:$0xff] %v1860_v62  ;;  %v627_v53 = vmul.f32 %v1022_v46, %v2377_v15  ;;  %v863_v55 = vmul.f32 %v2379_v48, %v1610_v24  ;;  %v2380_v5 = vld [vmem:[#allocation35_spill] sm:$0xff]  ;;  %v553_v46 = vadd.f32 %v552_v36, %v506_v25  ;;  %v232_v58 = vadd.f32 %v231_v28, %v185_v11  ;;  %v2381_v32 = vld [vmem:[#allocation49_spill] sm:$0xff]  ;;  %v2383_v3 = vld [vmem:[#allocation52_spill] sm:$0xff] }
  0x8f   :  { %2372 = vst [vmem:[#allocation23_spill] sm:$0xff] %v1865_v21  ;;  %v628_v50 = vmul.f32 %v1023_v54, %v2380_v5  ;;  %v673_v62 = vadd.f32 %v672_v9, %v626_v27  ;;  %v864_v51 = vmul.f32 %v2381_v32, %v1634_v61  ;;  %v1904_v15 = vld [vmem:[#allocation5 + $0x150] sm:$0xff]  ;;  %v188_v40 = vmul.f32 %v1893_v8, %v1808_v26  ;;  %v2382_v6 = vld [vmem:[#allocation39_spill] sm:$0xff]  ;;  %v1909_v9 = vld [vmem:[#allocation5 + $0x158] sm:$0xff] }
  0x90   :  { %2373 = vst [vmem:[#allocation13_spill] sm:$0xff] %v1873_v63  ;;  %v908_v49 = vadd.f32 %v907_v16, %v861_v4  ;;  %v1024_v24 = vld [vmem:[#allocation2 + $0x1d0] sm:$0xff]  ;;  %v554_v54 = vadd.f32 %v553_v46, %v507_v39  ;;  %v233_v25 = vadd.f32 %v232_v58, %v186_v29  ;;  %v1025_v27 = vld [vmem:[#allocation5 + $0x180] sm:$0xff]  ;;  %v1027_v28 = vld [vmem:[#allocation5 + $0x188] sm:$0xff] }
  0x91   :  { %2374 = vst [vmem:[#allocation38_spill] sm:$0xff] %v1879_v33  ;;  %v629_v23 = vmul.f32 %v1024_v24, %v2382_v6  ;;  %v674_v1 = vadd.f32 %v673_v62, %v627_v53  ;;  %v1026_v36 = vld [vmem:[#allocation2] sm:$0xff]  ;;  %v1028_v5 = vld [vmem:[#allocation2 + $0x8] sm:$0xff]  ;;  %v1029_v26 = vld [vmem:[#allocation2 + $0x1d8] sm:$0xff]  ;;  %v189_v62 = vmul.f32 %v1904_v15, %v1824_v19  ;;  %v190_v6 = vmul.f32 %v1909_v9, %v1838_v14 }
  0x92   :  { %2376 = vst [vmem:[#allocation25_spill] sm:$0xff] %v1888_v22  ;;  %v305_v11 = vmul.f32 %v1026_v36, %v1025_v27  ;;  %v306_v61 = vmul.f32 %v1028_v5, %v1027_v28  ;;  %v865_v22 = vmul.f32 %v2383_v3, %v1652_v31  ;;  %v909_v33 = vadd.f32 %v908_v49, %v862_v0  ;;  %v2384_v4 = vld [vmem:[#allocation42_spill] sm:$0xff]  ;;  %v1030_v53 = vld [vmem:[#allocation5 + $0x190] sm:$0xff] }
  0x93   :  { %2378 = vst [vmem:[#allocation40_spill] sm:$0xff] %v1893_v8  ;;  %v630_v16 = vmul.f32 %v1029_v26, %v2384_v4  ;;  %v675_v8 = vadd.f32 %v674_v1, %v628_v50  ;;  %v555_v24 = vadd.f32 %v554_v54, %v508_v60  ;;  %v234_v39 = vadd.f32 %v233_v25, %v187_v12  ;;  %v1031_v29 = vld [vmem:[#allocation2 + $0x10] sm:$0xff]  ;;  %v1916_v58 = vld [vmem:[#allocation5 + $0x160] sm:$0xff]  ;;  %v1033_v60 = vld [vmem:[#allocation5 + $0x198] sm:$0xff] }
  0x94   :  { %v307_v46 = vmul.f32 %v1031_v29, %v1030_v53  ;;  %v910_v27 = vadd.f32 %v909_v33, %v863_v55  ;;  %v1032_v31 = vld [vmem:[#allocation2 + $0x1e0] sm:$0xff]  ;;  %v2385_v0 = vld [vmem:[#allocation45_spill] sm:$0xff]  ;;  %v353_v28 = vadd.f32 %v306_v61, %v305_v11  ;;  %v1921_v12 = vld [vmem:[#allocation5 + $0x168] sm:$0xff] }
  0x95   :  { %v631_v49 = vmul.f32 %v1032_v31, %v2385_v0  ;;  %v676_v36 = vadd.f32 %v675_v8, %v629_v23  ;;  %v556_v26 = vadd.f32 %v555_v24, %v509_v45  ;;  %v235_v1 = vadd.f32 %v234_v39, %v188_v40  ;;  %v1034_v50 = vld [vmem:[#allocation2 + $0x18] sm:$0xff]  ;;  %v2386_v25 = vld [vmem:[#allocation55_spill] sm:$0xff]  ;;  %v2387_v29 = vld [vmem:[#allocation48_spill] sm:$0xff] }
  0x96   :  { %v308_v54 = vmul.f32 %v1034_v50, %v1033_v60  ;;  %v866_v5 = vmul.f32 %v2386_v25, %v1670_v7  ;;  %v911_v4 = vadd.f32 %v910_v27, %v864_v51  ;;  %v1035_v53 = vld [vmem:[#allocation2 + $0x1e8] sm:$0xff]  ;;  %v191_v8 = vmul.f32 %v1916_v58, %v1848_v43  ;;  %v1036_v55 = vld [vmem:[#allocation5 + $0x1a0] sm:$0xff]  ;;  %v1928_v11 = vld [vmem:[#allocation5 + $0x170] sm:$0xff] }
  0x97   :  { %v632_v14 = vmul.f32 %v1035_v53, %v2387_v29  ;;  %v677_v33 = vadd.f32 %v676_v36, %v630_v16  ;;  %557 = vadd.xlane.f32.xlu1 %v556_v26  ;;  %v236_v45 = vadd.f32 %v235_v1, %v189_v62  ;;  %v1037_v40 = vld [vmem:[#allocation2 + $0x20] sm:$0xff]  ;;  %v354_v24 = vadd.f32 %v353_v28, %v307_v46  ;;  %v2388_v61 = vld [vmem:[#allocation60_spill] sm:$0xff]  ;;  %v1935_v50 = vld [vmem:[#allocation5 + $0x178] sm:$0xff] }
  0x98   :  { %v309_v23 = vmul.f32 %v1037_v40, %v1036_v55  ;;  %v867_v39 = vmul.f32 %v2388_v61, %v1688_v57  ;;  %v912_v7 = vadd.f32 %v911_v4, %v865_v22  ;;  %v1038_v51 = vld [vmem:[#allocation2 + $0x1f0] sm:$0xff]  ;;  %v2389_v27 = vld [vmem:[#allocation51_spill] sm:$0xff]  ;;  %v192_v16 = vmul.f32 %v1921_v12, %v1856_v18  ;;  %v1041_v57 = vld [vmem:[#allocation2 + $0x1f8] sm:$0xff] }
  0x99   :  { %v633_v31 = vmul.f32 %v1038_v51, %v2389_v27  ;;  %v678_v0 = vadd.f32 %v677_v33, %v631_v49  ;;  %v237_v36 = vadd.f32 %v236_v45, %v190_v6  ;;  %v1039_v26 = vld [vmem:[#allocation5 + $0x1a8] sm:$0xff]  ;;  %v355_v60 = vadd.f32 %v354_v24, %v308_v54  ;;  %v2391_v22 = vld [vmem:[#allocation54_spill] sm:$0xff]  ;;  %v1042_v55 = vld [vmem:[#allocation5 + $0x1b0] sm:$0xff] }
  0x9a   :  { %v1040_v62 = vld [vmem:[#allocation2 + $0x28] sm:$0xff]  ;;  %v913_v53 = vadd.f32 %v912_v7, %v866_v5  ;;  %v634_v4 = vmul.f32 %v1041_v57, %v2391_v22  ;;  %v193_v49 = vmul.f32 %v1928_v11, %v1865_v21  ;;  %v1043_v6 = vld [vmem:[#allocation2 + $0x30] sm:$0xff]  ;;  %v1044_v27 = vld [vmem:[#allocation2 + $0x200] sm:$0xff]  ;;  %v194_v7 = vmul.f32 %v1935_v50, %v1873_v63 }
  0x9b   :  { %v310_v1 = vmul.f32 %v1040_v62, %v1039_v26  ;;  %v2390_v46 = vld [vmem:[#allocation64_spill] sm:$0xff]  ;;  %v679_v29 = vadd.f32 %v678_v0, %v632_v14  ;;  %v238_v33 = vadd.f32 %v237_v36, %v191_v8  ;;  %v311_v45 = vmul.f32 %v1043_v6, %v1042_v55  ;;  %v2393_v26 = vld [vmem:[#allocation57_spill] sm:$0xff]  ;;  %v2394_v36 = vld [vmem:[#allocation71_spill] sm:$0xff] }
  0x9c   :  { %v868_v28 = vmul.f32 %v2390_v46, %v1706_v35  ;;  %v356_v40 = vadd.f32 %v355_v60, %v309_v23  ;;  %v2392_v54 = vld [vmem:[#allocation68_spill] sm:$0xff]  ;;  %v914_v51 = vadd.f32 %v913_v53, %v867_v39  ;;  %v635_v35 = vmul.f32 %v1044_v27, %v2393_v26  ;;  %v1045_v0 = vld [vmem:[#allocation5 + $0x1b8] sm:$0xff]  ;;  %v1048_v6 = vld [vmem:[#allocation5 + $0x1c0] sm:$0xff] }
  0x9d   :  { %v869_v24 = vmul.f32 %v2392_v54, %v1724_v56  ;;  %v680_v5 = vadd.f32 %v679_v29, %v633_v31  ;;  %v239_v14 = vadd.f32 %v238_v33, %v192_v16  ;;  %v1046_v62 = vld [vmem:[#allocation2 + $0x38] sm:$0xff]  ;;  %v870_v22 = vmul.f32 %v2394_v36, %v1742_v20  ;;  %v1047_v60 = vld [vmem:[#allocation2 + $0x208] sm:$0xff]  ;;  %v1049_v27 = vld [vmem:[#allocation2 + $0x40] sm:$0xff] }
  0x9e   :  { %v312_v57 = vmul.f32 %v1046_v62, %v1045_v0  ;;  %v357_v8 = vadd.f32 %v356_v40, %v310_v1  ;;  %v915_v23 = vadd.f32 %v914_v51, %v868_v28  ;;  %v2395_v55 = vld [vmem:[#allocation62_spill] sm:$0xff]  ;;  %v313_v31 = vmul.f32 %v1049_v27, %v1048_v6  ;;  %v2396_v26 = vld [vmem:[#allocation75_spill] sm:$0xff]  ;;  %v1050_v63 = vld [vmem:[#allocation2 + $0x210] sm:$0xff] }
  0x9f   :  { %v636_v56 = vmul.f32 %v1047_v60, %v2395_v55  ;;  %v681_v39 = vadd.f32 %v680_v5, %v634_v4  ;;  %v240_v53 = vadd.f32 %v239_v14, %v193_v49  ;;  %v871_v16 = vmul.f32 %v2396_v26, %v1756_v17  ;;  %v2397_v0 = vld [vmem:[#allocation70_spill] sm:$0xff]  ;;  %v1051_v20 = vld [vmem:[#allocation5 + $0x1c8] sm:$0xff]  ;;  %v1054_v17 = vld [vmem:[#allocation5 + $0x1d0] sm:$0xff] }
  0xa0   :  { %v358_v29 = vadd.f32 %v357_v8, %v311_v45  ;;  %v916_v33 = vadd.f32 %v915_v23, %v869_v24  ;;  %v637_v1 = vmul.f32 %v1050_v63, %v2397_v0  ;;  %v1052_v28 = vld [vmem:[#allocation2 + $0x48] sm:$0xff]  ;;  %v872_v4 = vmul.f32 %v1562_v37, %v1768_v10  ;;  %v1053_v5 = vld [vmem:[#allocation2 + $0x218] sm:$0xff]  ;;  %v1055_v24 = vld [vmem:[#allocation2 + $0x50] sm:$0xff] }
  0xa1   :  { %v682_v40 = vadd.f32 %v681_v39, %v635_v35  ;;  %v241_v62 = vadd.f32 %v240_v53, %v194_v7  ;;  %v314_v51 = vmul.f32 %v1052_v28, %v1051_v20  ;;  %v2398_v14 = vld [vmem:[#allocation74_spill] sm:$0xff]  ;;  %v315_v23 = vmul.f32 %v1055_v24, %v1054_v17  ;;  %v1062_v20 = vld [vmem:[#allocation2 + $0x230] sm:$0xff]  ;;  %v2401_v28 = vld [vmem:[#allocation83_spill] sm:$0xff] }
  0xa2   :  { %v359_v21 = vadd.f32 %v358_v29, %v312_v57  ;;  %v917_v49 = vadd.f32 %v916_v33, %v870_v22  ;;  %v638_v45 = vmul.f32 %v1053_v5, %v2398_v14  ;;  %v873_v63 = vmul.f32 %v1582_v13, %v1782_v52  ;;  %v1056_v7 = vld [vmem:[#allocation2 + $0x220] sm:$0xff]  ;;  %v1057_v53 = vld [vmem:[#allocation5 + $0x1d8] sm:$0xff]  ;;  %v1059_v29 = vld [vmem:[#allocation2 + $0x228] sm:$0xff] }
  0xa3   :  { %v683_v8 = vadd.f32 %v682_v40, %v636_v56  ;;  %242 = vadd.xlane.f32.xlu0 %v241_v62  ;;  %v2399_v55 = vld [vmem:[#allocation78_spill] sm:$0xff]  ;;  %v874_v56 = vmul.f32 %v1600_v38, %v1794_v34  ;;  %v2400_v33 = vld [vmem:[#allocation80_spill] sm:$0xff]  ;;  %v875_v62 = vmul.f32 %v1624_v41, %v1810_v42 }
  0xa4   :  { %v360_v60 = vadd.f32 %v359_v21, %v313_v31  ;;  %v918_v35 = vadd.f32 %v917_v49, %v871_v16  ;;  %v639_v57 = vmul.f32 %v1056_v7, %v2399_v55  ;;  %v1058_v10 = vld [vmem:[#allocation2 + $0x58] sm:$0xff]  ;;  %v640_v0 = vmul.f32 %v1059_v29, %v2400_v33  ;;  %v1060_v31 = vld [vmem:[#allocation5 + $0x1e0] sm:$0xff]  ;;  %v1063_v5 = vld [vmem:[#allocation5 + $0x1e8] sm:$0xff] }
  0xa5   :  { %v684_v39 = vadd.f32 %v683_v8, %v637_v1  ;;  %v316_v22 = vmul.f32 %v1058_v10, %v1057_v53  ;;  %v1061_v40 = vld [vmem:[#allocation2 + $0x60] sm:$0xff]  ;;  %v641_v49 = vmul.f32 %v1062_v20, %v2401_v28  ;;  %v1064_v14 = vld [vmem:[#allocation2 + $0x68] sm:$0xff]  ;;  %v1065_v24 = vld [vmem:[#allocation2 + $0x238] sm:$0xff] }
  0xa6   :  { %v361_v6 = vadd.f32 %v360_v60, %v314_v51  ;;  %v919_v27 = vadd.f32 %v918_v35, %v872_v4  ;;  %v317_v52 = vmul.f32 %v1061_v40, %v1060_v31  ;;  %v318_v34 = vmul.f32 %v1064_v14, %v1063_v5  ;;  %v2402_v8 = vld [vmem:[#allocation91_spill] sm:$0xff]  ;;  %v2403_v60 = vld [vmem:[#allocation86_spill] sm:$0xff]  ;;  %v1066_v7 = vld [vmem:[#allocation5 + $0x1f0] sm:$0xff] }
  0xa7   :  { %v685_v21 = vadd.f32 %v684_v39, %v638_v45  ;;  %v876_v17 = vmul.f32 %v2402_v8, %v1826_v44  ;;  %v642_v35 = vmul.f32 %v1065_v24, %v2403_v60  ;;  %v2404_v55 = vld [vmem:[#allocation36_spill] sm:$0xff]  ;;  %v2405_v39 = vld [vmem:[#allocation95_spill] sm:$0xff]  ;;  %v1068_v29 = vld [vmem:[#allocation5 + $0x1f8] sm:$0xff] }
  0xa8   :  { %v362_v16 = vadd.f32 %v361_v6, %v315_v23  ;;  %v920_v1 = vadd.f32 %v919_v27, %v873_v63  ;;  %v319_v42 = vmul.f32 %v1066_v7, %v2404_v55  ;;  %v877_v53 = vmul.f32 %v2405_v39, %v1840_v2  ;;  %v1067_v10 = vld [vmem:[#allocation2 + $0x240] sm:$0xff]  ;;  %v2406_v6 = vld [vmem:[#allocation88_spill] sm:$0xff]  ;;  %v2407_v33 = vld [vmem:[#allocation41_spill] sm:$0xff] }
  0xa9   :  { %v686_v51 = vadd.f32 %v685_v21, %v639_v57  ;;  %v643_v27 = vmul.f32 %v1067_v10, %v2406_v6  ;;  %v320_v44 = vmul.f32 %v1068_v29, %v2407_v33  ;;  %v2408_v21 = vld [vmem:[#allocation32_spill] sm:$0xff]  ;;  %v2409_v31 = vld [vmem:[#allocation14_spill] sm:$0xff]  ;;  %v2415_v55 = vld [vmem:[#allocation103_spill] sm:$0xff] }
  0xaa   :  { %v363_v4 = vadd.f32 %v362_v16, %v316_v22  ;;  %v921_v45 = vadd.f32 %v920_v1, %v874_v56  ;;  %v878_v40 = vmul.f32 %v2409_v31, %v2408_v21  ;;  %v1069_v16 = vld [vmem:[#allocation2 + $0x248] sm:$0xff]  ;;  %v1070_v28 = vld [vmem:[#allocation5 + $0x200] sm:$0xff] }
  0xab   :  { %v687_v23 = vadd.f32 %v686_v51, %v640_v0  ;;  %v2410_v1 = vld [vmem:[#allocation92_spill] sm:$0xff]  ;;  %v2416_v10 = vld [vmem:[#allocation98_spill] sm:$0xff] }
  0xac   :  { %v364_v63 = vadd.f32 %v363_v4, %v317_v52  ;;  %v922_v57 = vadd.f32 %v921_v45, %v875_v62  ;;  %v644_v20 = vmul.f32 %v1069_v16, %v2410_v1  ;;  %v2411_v51 = vld [vmem:[#allocation44_spill] sm:$0xff]  ;;  %v2417_v29 = vld [vmem:[#allocation50_spill] sm:$0xff] }
  0xad   :  { %v688_v22 = vadd.f32 %v687_v23, %v641_v49  ;;  %v321_v2 = vmul.f32 %v1070_v28, %v2411_v51  ;;  %v2412_v5 = vld [vmem:[#allocation100_spill] sm:$0xff]  ;;  %v2414_v23 = vld [vmem:[#allocation47_spill] sm:$0xff]  ;;  %v2418_v33 = vld [vmem:[#allocation106_spill] sm:$0xff] }
  0xae   :  { %v365_v56 = vadd.f32 %v364_v63, %v318_v34  ;;  %v923_v0 = vadd.f32 %v922_v57, %v876_v17  ;;  %v879_v14 = vmul.f32 %v2412_v5, %v1858_v59  ;;  %v1071_v4 = vld [vmem:[#allocation2 + $0x250] sm:$0xff]  ;;  %v1072_v60 = vld [vmem:[#allocation5 + $0x208] sm:$0xff]  ;;  %v880_v63 = vmul.f32 %v2415_v55, %v1867_v47  ;;  %v1073_v57 = vld [vmem:[#allocation2 + $0x258] sm:$0xff] }
  0xaf   :  { %v689_v52 = vadd.f32 %v688_v22, %v642_v35  ;;  %v2413_v45 = vld [vmem:[#allocation96_spill] sm:$0xff]  ;;  %v322_v7 = vmul.f32 %v1072_v60, %v2414_v23  ;;  %v646_v6 = vmul.f32 %v1073_v57, %v2416_v10  ;;  %v1075_v21 = vld [vmem:[#allocation2 + $0x260] sm:$0xff]  ;;  %v1076_v1 = vld [vmem:[#allocation5 + $0x218] sm:$0xff] }
  0xb0   :  { %v366_v62 = vadd.f32 %v365_v56, %v319_v42  ;;  %v924_v49 = vadd.f32 %v923_v0, %v877_v53  ;;  %v645_v24 = vmul.f32 %v1071_v4, %v2413_v45  ;;  %v1074_v22 = vld [vmem:[#allocation5 + $0x210] sm:$0xff]  ;;  %v881_v56 = vmul.f32 %v2418_v33, %v1875_v30  ;;  %v2423_v30 = vld [vmem:[#allocation107_spill] sm:$0xff] }
  0xb1   :  { %v690_v34 = vadd.f32 %v689_v52, %v643_v27  ;;  %v323_v59 = vmul.f32 %v1074_v22, %v2417_v29  ;;  %v2419_v0 = vld [vmem:[#allocation101_spill] sm:$0xff]  ;;  %v2421_v51 = vld [vmem:[#allocation104_spill] sm:$0xff] }
  0xb2   :  { %v367_v17 = vadd.f32 %v366_v62, %v320_v44  ;;  %v925_v35 = vadd.f32 %v924_v49, %v878_v40  ;;  %v647_v16 = vmul.f32 %v1075_v21, %v2419_v0  ;;  %v2420_v52 = vld [vmem:[#allocation53_spill] sm:$0xff]  ;;  %v1077_v49 = vld [vmem:[#allocation5 + $0x220] sm:$0xff]  ;;  %v2422_v4 = vld [vmem:[#allocation56_spill] sm:$0xff] }
  0xb3   :  { %v691_v42 = vadd.f32 %v690_v34, %v644_v20  ;;  %v324_v47 = vmul.f32 %v1076_v1, %v2420_v52  ;;  %v648_v20 = vmul.f32 %v2379_v48, %v2421_v51  ;;  %v1078_v23 = vld [vmem:[#allocation5 + $0x228] sm:$0xff]  ;;  %v1079_v48 = vld [vmem:[#allocation5 + $0x230] sm:$0xff] }
  0xb4   :  { %v368_v53 = vadd.f32 %v367_v17, %v321_v2  ;;  %v926_v27 = vadd.f32 %v925_v35, %v879_v14  ;;  %v325_v2 = vmul.f32 %v1077_v49, %v2422_v4  ;;  %v649_v14 = vmul.f32 %v2381_v32, %v2423_v30  ;;  %v2426_v10 = vld [vmem:[#allocation61_spill] sm:$0xff]  ;;  %v2427_v22 = vld [vmem:[#allocation20_spill] sm:$0xff] }
  0xb5   :  { %v692_v44 = vadd.f32 %v691_v42, %v645_v24  ;;  %v2424_v24 = vld [vmem:[#allocation58_spill] sm:$0xff]  ;;  %v651_v29 = vmul.f32 %v2386_v25, %v2427_v22  ;;  %v2428_v32 = vld [vmem:[#allocation65_spill] sm:$0xff]  ;;  %v2429_v21 = vld [vmem:[#allocation24_spill] sm:$0xff] }
  0xb6   :  { %v369_v40 = vadd.f32 %v368_v53, %v322_v7  ;;  %v927_v28 = vadd.f32 %v926_v27, %v880_v63  ;;  %v326_v17 = vmul.f32 %v1078_v23, %v2424_v24  ;;  %v2425_v7 = vld [vmem:[#allocation18_spill] sm:$0xff]  ;;  %v652_v0 = vmul.f32 %v2388_v61, %v2429_v21  ;;  %v2430_v1 = vld [vmem:[#allocation69_spill] sm:$0xff]  ;;  %v1082_v51 = vld [vmem:[#allocation5 + $0x248] sm:$0xff] }
  0xb7   :  { %v693_v62 = vadd.f32 %v692_v44, %v646_v6  ;;  %v650_v63 = vmul.f32 %v2383_v3, %v2425_v7  ;;  %v327_v6 = vmul.f32 %v1079_v48, %v2426_v10  ;;  %v1080_v53 = vld [vmem:[#allocation5 + $0x238] sm:$0xff]  ;;  %v1081_v44 = vld [vmem:[#allocation5 + $0x240] sm:$0xff]  ;;  %v2433_v49 = vld [vmem:[#allocation28_spill] sm:$0xff] }
  0xb8   :  { %v370_v45 = vadd.f32 %v369_v40, %v323_v59  ;;  %v928_v34 = vadd.f32 %v927_v28, %v881_v56  ;;  %v328_v56 = vmul.f32 %v1080_v53, %v2428_v32  ;;  %v329_v3 = vmul.f32 %v1081_v44, %v2430_v1  ;;  %v1084_v24 = vld [vmem:[#allocation5 + $0x258] sm:$0xff]  ;;  %v2437_v7 = vld [vmem:[#allocation12_spill] sm:$0xff]  ;;  %v1085_v48 = vld [vmem:[#allocation5 + $0x260] sm:$0xff] }
  0xb9   :  { %v694_v60 = vadd.f32 %v693_v62, %v647_v16  ;;  %v654_v4 = vmul.f32 %v2392_v54, %v2433_v49  ;;  %v2438_v10 = vld [vmem:[#allocation82_spill] sm:$0xff]  ;;  %v2440_v53 = vld [vmem:[#allocation85_spill] sm:$0xff] }
  0xba   :  { %v371_v35 = vadd.f32 %v370_v45, %v324_v47  ;;  %929 = vadd.xlane.f32.xlu2 %v928_v34  ;;  %v2431_v47 = vld [vmem:[#allocation11_spill] sm:$0xff]  ;;  %v1083_v45 = vld [vmem:[#allocation5 + $0x250] sm:$0xff]  ;;  %v333_v54 = vmul.f32 %v1085_v48, %v2438_v10 }
  0xbb   :  { %v695_v57 = vadd.f32 %v694_v60, %v648_v20  ;;  %v653_v40 = vmul.f32 %v2390_v46, %v2431_v47  ;;  %v2432_v20 = vld [vmem:[#allocation72_spill] sm:$0xff]  ;;  %v2443_v1 = vld [vmem:[#allocation25_spill] sm:$0xff] }
  0xbc   :  { %v372_v42 = vadd.f32 %v371_v35, %v325_v2  ;;  %v330_v25 = vmul.f32 %v1082_v51, %v2432_v20  ;;  %v2434_v34 = vld [vmem:[#allocation76_spill] sm:$0xff]  ;;  %v1088_v47 = vld [vmem:[#allocation5 + $0x278] sm:$0xff] }
  0xbd   :  { %v696_v59 = vadd.f32 %v695_v57, %v649_v14  ;;  %v331_v61 = vmul.f32 %v1083_v45, %v2434_v34  ;;  %v2435_v14 = vld [vmem:[#allocation30_spill] sm:$0xff]  ;;  %v2445_v51 = vld [vmem:[#allocation40_spill] sm:$0xff]  ;;  %v2446_v49 = vld [vmem:[#allocation97_spill] sm:$0xff] }
  0xbe   :  { %v373_v27 = vadd.f32 %v372_v42, %v326_v17  ;;  %v655_v60 = vmul.f32 %v2394_v36, %v2435_v14  ;;  %v2436_v17 = vld [vmem:[#allocation79_spill] sm:$0xff]  ;;  %v2439_v42 = vld [vmem:[#allocation34_spill] sm:$0xff]  ;;  %v660_v20 = vmul.f32 %v1624_v41, %v2445_v51  ;;  %v662_v14 = vmul.f32 %v2405_v39, %v1909_v9  ;;  %v2453_v10 = vld [vmem:[#allocation108_spill] sm:$0xff] }
  0xbf   :  { %v697_v16 = vadd.f32 %v696_v59, %v650_v63  ;;  %v332_v46 = vmul.f32 %v1084_v24, %v2436_v17  ;;  %v656_v63 = vmul.f32 %v2396_v26, %v2437_v7  ;;  %v657_v22 = vmul.f32 %v1562_v37, %v2439_v42  ;;  %v1086_v59 = vld [vmem:[#allocation5 + $0x268] sm:$0xff]  ;;  %v2451_v7 = vld [vmem:[#allocation105_spill] sm:$0xff]  ;;  %v2467_v51 = vld [vmem:[#allocation94_spill] sm:$0xff] }
  0xc0   :  { %v374_v52 = vadd.f32 %v373_v27, %v327_v6  ;;  %v334_v36 = vmul.f32 %v1086_v59, %v2440_v53  ;;  %v2447_v34 = vld [vmem:[#allocation99_spill] sm:$0xff]  ;;  %v666_v59 = vmul.f32 %v2418_v33, %v1935_v50  ;;  %v2465_v33 = vld [vmem:[#allocation90_spill] sm:$0xff] }
  0xc1   :  { %v698_v28 = vadd.f32 %v697_v16, %v651_v29  ;;  %v2442_v16 = vld [vmem:[#allocation89_spill] sm:$0xff]  ;;  %v2450_v24 = vld [vmem:[#allocation63_spill] sm:$0xff] }
  0xc2   :  { %v375_v62 = vadd.f32 %v374_v52, %v328_v56  ;;  %v2441_v56 = vld [vmem:[#allocation38_spill] sm:$0xff] }
  0xc3   :  { %v699_v2 = vadd.f32 %v698_v28, %v652_v0  ;;  %v658_v27 = vmul.f32 %v1582_v13, %v2441_v56  ;;  %v1087_v0 = vld [vmem:[#allocation5 + $0x270] sm:$0xff] }
  0xc4   :  { %v376_v30 = vadd.f32 %v375_v62, %v329_v3  ;;  %v335_v26 = vmul.f32 %v1087_v0, %v2442_v16  ;;  %v659_v3 = vmul.f32 %v1600_v38, %v2443_v1  ;;  %v1089_v62 = vld [vmem:[#allocation5 + $0x280] sm:$0xff] }
  0xc5   :  { %v700_v23 = vadd.f32 %v699_v2, %v653_v40  ;;  %v2444_v40 = vld [vmem:[#allocation93_spill] sm:$0xff]  ;;  %v337_v13 = vmul.f32 %v1089_v62, %v2446_v49  ;;  %v661_v2 = vmul.f32 %v2402_v8, %v1904_v15 }
  0xc6   :  { %v377_v35 = vadd.f32 %v376_v30, %v330_v25  ;;  %v336_v37 = vmul.f32 %v1088_v47, %v2444_v40  ;;  %v347_v40 = vmul.f32 %v2465_v33, %v1824_v19  ;;  %v2468_v62 = vld [vmem:[#allocation37_spill] sm:$0xff] }
  0xc7   :  { %v701_v57 = vadd.f32 %v700_v23, %v654_v4  ;;  %v2449_v23 = vld [vmem:[#allocation102_spill] sm:$0xff]  ;;  %v349_v49 = vmul.f32 %v2468_v62, %v1848_v43 }
  0xc8   :  { %v378_v6 = vadd.f32 %v377_v35, %v331_v61  ;;  %v2448_v61 = vld [vmem:[#allocation59_spill] sm:$0xff]  ;;  %v339_v41 = vmul.f32 %v2450_v24, %v2449_v23 }
  0xc9   :  { %v702_v29 = vadd.f32 %v701_v57, %v655_v60  ;;  %v338_v38 = vmul.f32 %v2448_v61, %v2447_v34  ;;  %v664_v57 = vmul.f32 %v2412_v5, %v1921_v12  ;;  %v2470_v34 = vld [vmem:[#allocation23_spill] sm:$0xff]  ;;  %v2471_v61 = vld [vmem:[#allocation16_spill] sm:$0xff] }
  0xca   :  { %v379_v32 = vadd.f32 %v378_v6, %v332_v46  ;;  %v663_v46 = vmul.f32 %v2409_v31, %v1916_v58  ;;  %v665_v6 = vmul.f32 %v2415_v55, %v1928_v11  ;;  %v2461_v11 = vld [vmem:[#allocation19_spill] sm:$0xff]  ;;  %v2462_v55 = vld [vmem:[#allocation84_spill] sm:$0xff] }
  0xcb   :  { %v703_v21 = vadd.f32 %v702_v29, %v656_v63  ;;  %v2452_v63 = vld [vmem:[#allocation66_spill] sm:$0xff]  ;;  %v2456_v29 = vld [vmem:[#allocation73_spill] sm:$0xff] }
  0xcc   :  { %v380_v44 = vadd.f32 %v379_v32, %v333_v54  ;;  %v340_v15 = vmul.f32 %v2452_v63, %v2451_v7  ;;  %v2454_v54 = vld [vmem:[#allocation67_spill] sm:$0xff]  ;;  %v2458_v32 = vld [vmem:[#allocation77_spill] sm:$0xff] }
  0xcd   :  { %v704_v52 = vadd.f32 %v703_v21, %v657_v22  ;;  %v341_v9 = vmul.f32 %v2454_v54, %v2453_v10  ;;  %v2455_v22 = vld [vmem:[#allocation109_spill] sm:$0xff] }
  0xce   :  { %v381_v28 = vadd.f32 %v380_v44, %v334_v36  ;;  %v342_v58 = vmul.f32 %v2456_v29, %v2455_v22  ;;  %v2457_v36 = vld [vmem:[#allocation110_spill] sm:$0xff]  ;;  %v2460_v21 = vld [vmem:[#allocation81_spill] sm:$0xff]  ;;  %v345_v44 = vmul.f32 %v2462_v55, %v2461_v11 }
  0xcf   :  { %v705_v25 = vadd.f32 %v704_v52, %v658_v27  ;;  %v343_v12 = vmul.f32 %v2458_v32, %v2457_v36  ;;  %v2459_v27 = vld [vmem:[#allocation26_spill] sm:$0xff]  ;;  %v2464_v52 = vld [vmem:[#allocation87_spill] sm:$0xff] }
  0xd0   :  { %v382_v4 = vadd.f32 %v381_v28, %v335_v26  ;;  %v344_v0 = vmul.f32 %v2460_v21, %v2459_v27  ;;  %v2466_v28 = vld [vmem:[#allocation22_spill] sm:$0xff] }
  0xd1   :  { %v706_v45 = vadd.f32 %v705_v25, %v659_v3  ;;  %v2463_v3 = vld [vmem:[#allocation21_spill] sm:$0xff] }
  0xd2   :  { %v383_v30 = vadd.f32 %v382_v4, %v336_v37  ;;  %v346_v47 = vmul.f32 %v2464_v52, %v2463_v3  ;;  %v2469_v4 = vld [vmem:[#allocation15_spill] sm:$0xff] }
  0xd3   :  { %v707_v60 = vadd.f32 %v706_v45, %v660_v20  ;;  %v348_v20 = vmul.f32 %v2467_v51, %v2466_v28 }
  0xd4   :  { %v384_v17 = vadd.f32 %v383_v30, %v337_v13 }
  0xd5   :  { %v708_v35 = vadd.f32 %v707_v60, %v661_v2  ;;  %v350_v2 = vmul.f32 %v2469_v4, %v1856_v18  ;;  %v2473_v60 = vld [vmem:[#allocation17_spill] sm:$0xff] }
  0xd6   :  { %v385_v8 = vadd.f32 %v384_v17, %v338_v38  ;;  %v351_v38 = vmul.f32 %v2471_v61, %v2470_v34 }
  0xd7   :  { %v709_v48 = vadd.f32 %v708_v35, %v662_v14  ;;  %v2472_v14 = vld [vmem:[#allocation13_spill] sm:$0xff] }
  0xd8   :  { %v386_v39 = vadd.f32 %v385_v8, %v339_v41  ;;  %v352_v19 = vmul.f32 %v2473_v60, %v2472_v14 }
  0xd9   :  { %v710_v42 = vadd.f32 %v709_v48, %v663_v46 }
  0xda   :  { %v387_v31 = vadd.f32 %v386_v39, %v340_v15 }
  0xdb   :  { %v711_v53 = vadd.f32 %v710_v42, %v664_v57 }
  0xdc   :  { %v388_v5 = vadd.f32 %v387_v31, %v341_v9 }
  0xdd   :  { %v712_v56 = vadd.f32 %v711_v53, %v665_v6 }
  0xde   :  { %v389_v16 = vadd.f32 %v388_v5, %v342_v58 }
  0xdf   :  { %v713_v26 = vadd.f32 %v712_v56, %v666_v59 }
  0xe0   :  { %v390_v1 = vadd.f32 %v389_v16, %v343_v12 }
  0xe1   :  { %714 = vadd.xlane.f32.xlu1 %v713_v26 }
  0xe2   :  { %v391_v50 = vadd.f32 %v390_v1, %v344_v0 }
  0xe4   :  { %v392_v37 = vadd.f32 %v391_v50, %v345_v44 }
  0xe6   :  { %v393_v25 = vadd.f32 %v392_v37, %v346_v47 }
  0xe8   :  { %v394_v13 = vadd.f32 %v393_v25, %v347_v40  ;;  %v47_v40 = vlaneseq }
  0xe9   :  { %v823_v8 = vpop.xlane.xlu2 %822 }
  0xea   :  { %v395_v45 = vadd.f32 %v394_v13, %v348_v20  ;;  %v824_v39 = vrot.slane %v823_v8, 4  ;;  %v48_v37 = vshrl.u32 %v47_v40, 7  ;;  %v50_v28 = vand.u32 127, %v47_v40 }
  0xec   :  { %v396_v30 = vadd.f32 %v395_v45, %v349_v49  ;;  %v825_v29 = vadd.f32 %v824_v39, %v823_v8  ;;  %vm251_vm0 = vcmp.eq.s32.totalorder %v48_v37, 0  ;;  %vm252_vm1 = vcmp.eq.s32.totalorder %v50_v28, 0 }
  0xed   :  { %vm409_vm2 = vcmp.eq.s32.totalorder %v50_v28, 1  ;;  %vm566_vm3 = vcmp.eq.s32.totalorder %v50_v28, 2  ;;  %vm253_vm4 = vmand %vm251_vm0, %vm252_vm1  ;;  %vm723_vm5 = vcmp.eq.s32.totalorder %v48_v37, 1 }
  0xee   :  { %v397_v23 = vadd.f32 %v396_v30, %v350_v2  ;;  %v826_v32 = vrot.slane %v825_v29, 2  ;;  %vm410_vm6 = vmand %vm251_vm0, %vm409_vm2  ;;  %v1015_v2 = vld [vmem:[%s2088_s2] ss:$0 sm:$0xff]  ;;  %s1172_s2 = smov [#allocation7]  }
  0xef   :  { %vm567_vm7 = vmand %vm251_vm0, %vm566_vm3  ;;  %s985_s30 = sshll.u32 %s1172_s2, 4  ;;  %s986_s30 = int_to_ptr.vmem [resolvable:$true] %s985_s30 }
  0xf0   :  { %v398_v24 = vadd.f32 %v397_v23, %v351_v38  ;;  %v827_v0 = vadd.f32 %v826_v32, %v825_v29  ;;  %vm724_vm8 = vmand %vm723_vm5, %vm252_vm1 }
  0xf1   :  { %vm831_vm9 = vmand %vm723_vm5, %vm409_vm2 }
  0xf2   :  { %v399_v41 = vadd.f32 %v398_v24, %v352_v19  ;;  %v828_v1 = vrot.slane %v827_v0, 1  ;;  %vm938_vm10 = vmand %vm723_vm5, %vm566_vm3 }
  0xf4   :  { %400 = vadd.xlane.f32.xlu0 %v399_v41  ;;  %v829_v33 = vadd.f32 %v828_v1, %v827_v0 }
 0x10a   :  { %v558_v18 = vpop.xlane.xlu1 %557 }
 0x10b   :  { %v559_v54 = vrot.slane %v558_v18, 4 }
 0x10d   :  { %v560_v42 = vadd.f32 %v559_v54, %v558_v18 }
 0x10f   :  { %v561_v31 = vrot.slane %v560_v42, 2 }
 0x111   :  { %v562_v56 = vadd.f32 %v561_v31, %v560_v42 }
 0x113   :  { %v563_v11 = vrot.slane %v562_v56, 1 }
 0x115   :  { %v564_v47 = vadd.f32 %v563_v11, %v562_v56 }
 0x116   :  { %v243_v17 = vpop.xlane.xlu0 %242 }
 0x117   :  { %v244_v46 = vrot.slane %v243_v17, 4 }
 0x119   :  { %v245_v35 = vadd.f32 %v244_v46, %v243_v17 }
 0x11b   :  { %v246_v43 = vrot.slane %v245_v35, 2 }
 0x11d   :  { %v247_v7 = vadd.f32 %v246_v43, %v245_v35 }
 0x11f   :  { %v248_v63 = vrot.slane %v247_v7, 1 }
 0x121   :  { %v249_v15 = vadd.f32 %v248_v63, %v247_v7 }
 0x123   :  { %998 = vpush %v249_v15 }
 0x12d   :  { %v930_v48 = vpop.xlane.xlu2 %929 }
 0x12e   :  { %v931_v9 = vrot.slane %v930_v48, 4 }
 0x130   :  { %v932_v22 = vadd.f32 %v931_v9, %v930_v48 }
 0x132   :  { %v933_v53 = vrot.slane %v932_v22, 2 }
 0x134   :  { %v934_v27 = vadd.f32 %v933_v53, %v932_v22 }
 0x136   :  { %v935_v44 = vrot.slane %v934_v27, 1 }
 0x138   :  { %v936_v50 = vadd.f32 %v935_v44, %v934_v27 }
 0x154   :  { %v715_v57 = vpop.xlane.xlu1 %714  ;;  %s999_s0 = spop %998 }
 0x155   :  { %v716_v10 = vrot.slane %v715_v57, 4  ;;  %v254_v51 = vstv %s999_s0 }
 0x156   :  { %v255_v20 = vsel %vm253_vm4, %v254_v51, 0.0 }
 0x157   :  { %v717_v6 = vadd.f32 %v716_v10, %v715_v57 }
 0x159   :  { %v718_v58 = vrot.slane %v717_v6, 2 }
 0x15b   :  { %v719_v12 = vadd.f32 %v718_v58, %v717_v6 }
 0x15d   :  { %v720_v26 = vrot.slane %v719_v12, 1 }
 0x15f   :  { %v721_v52 = vadd.f32 %v720_v26, %v719_v12 }
 0x167   :  { %v401_v59 = vpop.xlane.xlu0 %400 }
 0x168   :  { %v402_v36 = vrot.slane %v401_v59, 4 }
 0x16a   :  { %v403_v5 = vadd.f32 %v402_v36, %v401_v59 }
 0x16c   :  { %v404_v21 = vrot.slane %v403_v5, 2 }
 0x16e   :  { %v405_v16 = vadd.f32 %v404_v21, %v403_v5 }
 0x170   :  { %v406_v55 = vrot.slane %v405_v16, 1 }
 0x172   :  { %v407_v3 = vadd.f32 %v406_v55, %v405_v16 }
 0x174   :  { %1000 = vpush %v407_v3 }
 0x175   :  { %1002 = vpush %v564_v47 }
 0x176   :  { %1004 = vpush %v721_v52 }
 0x177   :  { %1006 = vpush %v829_v33 }
 0x178   :  { %1008 = vpush %v936_v50 }
 0x1a5   :  { %s1001_s1 = spop %1000 }
 0x1a6   :  { %v411_v25 = vstv %s1001_s1  ;;  %s1003_s24 = spop %1002 }
 0x1a7   :  { %v412_v62 = vsel %vm410_vm6, %v411_v25, %v255_v20  ;;  %v568_v49 = vstv %s1003_s24  ;;  %s1005_s25 = spop %1004 }
 0x1a8   :  { %v569_v13 = vsel %vm567_vm7, %v568_v49, %v412_v62  ;;  %v725_v4 = vstv %s1005_s25  ;;  %s1007_s26 = spop %1006 }
 0x1a9   :  { %v726_v45 = vsel %vm724_vm8, %v725_v4, %v569_v13  ;;  %v832_v34 = vstv %s1007_s26  ;;  %s1009_s29 = spop %1008 }
 0x1aa   :  { %v833_v61 = vsel %vm831_vm9, %v832_v34, %v726_v45  ;;  %v939_v38 = vstv %s1009_s29 }
 0x1ab   :  { %v940_v30 = vsel %vm938_vm10, %v939_v38, %v833_v61 }
 0x1ac   :  { %v945_v14 = vadd.f32 %v1015_v2, %v940_v30 }
 0x1ae   :  { %v947_v60 = vsel %vm946_vm11, %v945_v14, -inf }
 0x1af   :  { %v948_v19 = vrot.slane %v947_v60, 4 }
 0x1b1   :  { %v949_v23 = vmax.f32 %v947_v60, %v948_v19 }
 0x1b3   :  { %v950_v24 = vrot.slane %v949_v23, 2 }
 0x1b5   :  { %v951_v41 = vmax.f32 %v949_v23, %v950_v24 }
 0x1b7   :  { %v952_v17 = vrot.slane %v951_v41, 1 }
 0x1b9   :  { %v953_v46 = vmax.f32 %v951_v41, %v952_v17 }
 0x1bb   :  { %v954_v35 = vsub.f32 %v945_v14, %v953_v46 }
 0x1bd   :  { %v955_v43 = vmul.f32 1.442695, %v954_v35 }
 0x1bf   :  { %1016 = vpow2.f32 %v955_v43 }
 0x1c5   :  { %v1017_v7 = vpop.eup %1016 }
 0x1c6   :  { %v957_v63 = vsel %vm946_vm11, %v1017_v7, 0.0 }
 0x1c7   :  { %v958_v15 = vrot.slane %v957_v63, 4 }
 0x1c9   :  { %v959_v18 = vadd.f32 %v958_v15, %v957_v63 }
 0x1cb   :  { %v960_v8 = vrot.slane %v959_v18, 2 }
 0x1cd   :  { %v961_v57 = vadd.f32 %v960_v8, %v959_v18 }
 0x1cf   :  { %v962_v48 = vrot.slane %v961_v57, 1 }
 0x1d1   :  { %v963_v10 = vadd.f32 %v962_v48, %v961_v57 }
 0x1d3   :  { %1018 = vrcp.f32 %v963_v10  ;;  %v975_v6 = vand.u32 2147483648, %v963_v10  ;;  %v973_v22 = vand.u32 2147483647, %v963_v10  ;;  %vm969_vm13 = vweird.f32 %v963_v10 }
 0x1d5   :  { %v976_v58 = vor.u32 1.1754944e-38, %v975_v6  ;;  %vm974_vm15 = vcmp.eq.f32.partialorder %v973_v22, 8.507059e+37 }
 0x1d9   :  { %v1019_v54 = vpop.eup %1018 }
 0x1da   :  { %v965_v9 = vmul.f32 %v1019_v54, %v963_v10  ;;  %vm970_vm12 = vweird.f32 %v1019_v54 }
 0x1db   :  { %vm971_vm14 = vmor %vm969_vm13, %vm970_vm12 }
 0x1dc   :  { %v966_v39 = vsub.f32 1.0, %v965_v9 }
 0x1de   :  { %v967_v42 = vmul.f32 %v1019_v54, %v966_v39 }
 0x1e0   :  { %v968_v29 = vadd.f32 %v1019_v54, %v967_v42 }
 0x1e2   :  { %v972_v31 = vsel %vm971_vm14, %v1019_v54, %v968_v29 }
 0x1e3   :  { %v977_v59 = vsel %vm974_vm15, %v976_v58, %v972_v31 }
 0x1e4   :  { %v978_v53 = vmul.f32 %v1017_v7, %v977_v59 }
 0x1e6   :  { %979 = vst.msk [vmem:[#allocation7] sm:$0x3] %vm946_vm11, %v978_v53 }
 0x1e7   :  { %990 = dma.vmem_to_hbm [thread:$0]  %s986_s30, 32, %s988_s6, [#allocation4]  }
 0x1e8   :  { %1166 = dma.done.wait [#allocation4], 32  }
 0x1e9   :  { %1167 = vsyncadd [#allocation4], 4294967264 }
 0x1ea   :  { %995 = vsyncpa [#allocation3], 1 }
 0x1eb   :  { %996 = vsyncpa [#allocation6], 1 }
 0x1ec   :  { %997 = vsyncpa [#allocation4], 1 }

</bundles_post_ra>
